<compile_context>
chip_gen: v5e
topology: v5e:2x2
jax: 0.10.0
libtpu: 0.0.40
codegen_flags: <defaults>
</compile_context>

<pallas_src>
import jax
import jax.numpy as jnp
from jax.experimental import pallas as pl
from jax.experimental.pallas import tpu as pltpu


def _round8(n):
    return ((n + 7) // 8) * 8


# ----------------------------- fused Pallas kernel -----------------------------

def _gat_layer(h, W, A, b, neg_mask, H, D, negative_slope, apply_act, hcat_ref):
    """One dense GATConv layer (all heads), values kept in VMEM/registers.

    h        [N, Fin]     node features (value)
    W        [Fin, H*D]   fc weight, heads concatenated on the lane axis
    A        [H*D, 2H]    fused [attn_l | attn_r] block-diagonal per-head attention vectors
    b        [1, H*D]     bias
    neg_mask [N, N]       additive mask: 0.0 on edges, -1e30 on non-edges
    hcat_ref [N, >=H*D]   VMEM scratch used to assemble head outputs lane-dense
    """
    HD = H * D
    Wh = jnp.dot(h, W, preferred_element_type=jnp.float32)            # [N, H*D]  (MXU)
    ELR = jnp.dot(Wh, A, preferred_element_type=jnp.float32)          # [N, 2H]   fused el|er
    ELT = jnp.transpose(ELR[:, 0:H])                                  # [H, N]    src terms (XLU)
    ER = ELR[:, H:2 * H]                                              # [N, H]    dst terms

    out = None
    # TODO(synk): per-head softmax stays a static loop (H small); head-batched block-diagonal
    # layout (review item) only pays off once the segmented reductions are hoisted.
    for head in range(H):
        e = ER[:, head:head + 1] + ELT[head:head + 1, :]              # [N_dst, N_src]
        e = jnp.where(e > 0, e, negative_slope * e)                   # LeakyReLU
        e = e + neg_mask                                              # mask non-edges (additive)
        mx = jnp.max(e, axis=1, keepdims=True)                        # edge-softmax over src
        p = jnp.exp(e - mx)
        s = jnp.sum(p, axis=1, keepdims=True)
        alpha = p * pl.reciprocal(s, approx=True)                     # divide on the EUP
        oh = jnp.dot(alpha, Wh[:, head * D:(head + 1) * D],
                     preferred_element_type=jnp.float32)              # [N, D]
        if H == 1:
            out = oh
        else:
            # scatter to scratch at a static lane offset (store slot) instead of concatenating
            hcat_ref[:, head * D:(head + 1) * D] = oh
    if H > 1:
        out = hcat_ref[:, 0:HD]                                       # lane-dense read-back
    out = out + b
    if apply_act:
        out = jnp.maximum(out, 0.0)                                   # relu
    return out


def _make_fused_kernel(layer_cfgs, imp_off, in_dim, mask_off,
                       negative_slope, observed, imputed):
    """layer_cfgs: tuple of (fin, H, D, w_off, a_off, b_off, apply_act) per GAT layer."""

    def kernel(x_ref, negmask_ref, p_ref, o_ref, hcat_ref):
        x = x_ref[...]                                                # [N, F] original features
        N, F = x.shape
        imp = p_ref[imp_off:imp_off + N, 0:in_dim]                    # imp_feat (packed)
        h = jnp.where(jnp.isnan(x), imp, x)                           # feature imputation
        neg_mask = negmask_ref[...]                                   # [N_dst, N_src] additive

        for (fin, H, D, w_off, a_off, b_off, apply_act) in layer_cfgs:
            hd = H * D
            W = p_ref[w_off:w_off + fin, 0:hd]
            A = p_ref[a_off:a_off + hd, 0:2 * H]
            b = p_ref[b_off:b_off + 1, 0:hd]
            h = _gat_layer(h, W, A, b, neg_mask, H, D,
                           negative_slope, apply_act, hcat_ref)
        recon = h                                                     # [N, F] reconstruction

        # Split masked MSE on the ORIGINAL x (MSELoss reduction='mean' per partition).
        d2 = (x - recon) ** 2                                         # [N, F]
        m = p_ref[mask_off:mask_off + N, 0:1]                         # [N, 1]; 1 = reliable row
        row = jnp.sum(d2, axis=1, keepdims=True)                      # [N, 1] single lane reduce
        total = jnp.sum(row, axis=0, keepdims=True)                   # [1, 1]
        rel = jnp.sum(row * m, axis=0, keepdims=True)                 # [1, 1]
        unrel = total - rel                                           # no 2nd masked reduction
        n_rel_rows = jnp.sum(m, axis=0, keepdims=True)                # [1, 1]
        n_rel = jnp.maximum(n_rel_rows * F, 1.0)                      # guard empty partitions
        n_unrel = jnp.maximum((N - n_rel_rows) * F, 1.0)
        o_ref[...] = observed * rel / n_rel + imputed * unrel / n_unrel

    return kernel


# ----------------------------- host-side packing (glue) -----------------------------

def attn_block_diag(a):
    """[H, D] per-head attention vector -> block-diagonal [H*D, H] matrix."""
    H, D = a.shape
    m = jnp.zeros((H * D, H), jnp.float32)
    for h in range(H):
        m = m.at[h * D:(h + 1) * D, h].set(a[h])
    return m


def pack_premodel_params(params, feature_unmask):
    """Fold encoder_to_decoder into the decoder fc weight and pack every constructor-time
    constant into ONE 8-row-aligned f32 buffer (single parameter DMA per kernel call)."""
    Wd, ald, ard, bd = params["dec_layer"]
    # rep only enters the decoder through fc(), so fc(rep) = enc_rep @ (W_e2d @ Wd).
    Wd_fused = jnp.dot(params["W_e2d"], Wd)
    layers = list(params["enc_layers"]) + [(Wd_fused, ald, ard, bd)]

    imp = jnp.asarray(params["imp_feat"], jnp.float32)
    N, in_dim = imp.shape

    off = 0
    lane_w = in_dim
    max_hd = 1
    cfgs = []
    slots = []
    for li, (W, al, ar, b) in enumerate(layers):
        fin, hd = W.shape
        H = al.shape[1]
        D = hd // H
        w_off = off; off += _round8(fin)
        a_off = off; off += _round8(hd)
        b_off = off; off += 8
        slots.append((w_off, jnp.asarray(W, jnp.float32)))
        slots.append((a_off, jnp.concatenate([al, ar], axis=1).astype(jnp.float32)))
        slots.append((b_off, jnp.asarray(b, jnp.float32).reshape(1, hd)))
        cfgs.append((fin, H, D, w_off, a_off, b_off, li < len(layers) - 1))
        lane_w = max(lane_w, hd, 2 * H)
        max_hd = max(max_hd, hd)

    imp_off = off; off += _round8(N)
    slots.append((imp_off, imp))
    mask_off = off; off += _round8(N)
    slots.append((mask_off, feature_unmask.astype(jnp.float32).reshape(N, 1)))

    packed = jnp.zeros((off, lane_w), jnp.float32)
    for row, arr in slots:
        r, c = arr.shape
        packed = packed.at[row:row + r, 0:c].set(arr)

    meta = dict(layer_cfgs=tuple(cfgs), imp_off=imp_off, mask_off=mask_off,
                in_dim=in_dim, num_nodes=N, max_hd=max_hd)
    return packed, meta


def make_premodel_forward(meta, *, observed, imputed, negative_slope):
    """Returns a jitted fwd(x, neg_mask, packed_params) -> scalar loss."""
    kernel = _make_fused_kernel(meta["layer_cfgs"], meta["imp_off"], meta["in_dim"],
                                meta["mask_off"], float(negative_slope),
                                float(observed), float(imputed))
    N = meta["num_nodes"]
    max_hd = meta["max_hd"]

    @jax.jit
    def fwd(x, neg_mask, packed_params):
        # No grid / dimension_semantics: single-step, fully VMEM-resident kernel.
        loss = pl.pallas_call(
            kernel,
            out_shape=jax.ShapeDtypeStruct((1, 1), jnp.float32),
            scratch_shapes=[pltpu.VMEM((N, max_hd), jnp.float32)],
        )(x, neg_mask, packed_params)
        return loss[0, 0]

    return fwd


# --------------------------------- demo ---------------------------------

if __name__ == "__main__":
    # Small shapes consistent with the module constructor.
    N = 32            # number of graph nodes (features_unmask.size(0))
    in_dim = 16
    num_hidden = 32
    num_layers = 2
    nhead = 4
    nhead_out = 1     # decoder heads (so recon dim == in_dim with concat_out=True)
    negative_slope = 0.2
    observed, imputed = 1.0, 0.5

    enc_num_hidden = num_hidden // nhead          # per-head hidden dim in encoder

    key = jax.random.PRNGKey(0)
    keys = jax.random.split(key, 16)

    def xavier(k, shape, gain=1.0):
        fan_in, fan_out = shape[0], shape[-1]
        std = gain * (2.0 / (fan_in + fan_out)) ** 0.5
        return (std * jax.random.normal(k, shape)).astype(jnp.float32)

    # encoder layer 0: in_dim -> nhead * enc_num_hidden
    W0 = xavier(keys[0], (in_dim, nhead * enc_num_hidden), 2 ** 0.5)
    al0 = attn_block_diag(xavier(keys[1], (nhead, enc_num_hidden), 2 ** 0.5))
    ar0 = attn_block_diag(xavier(keys[2], (nhead, enc_num_hidden), 2 ** 0.5))
    b0 = jnp.zeros((1, nhead * enc_num_hidden), jnp.float32)
    # encoder layer 1 (last encoding layer keeps activation)
    W1 = xavier(keys[3], (num_hidden, nhead * enc_num_hidden), 2 ** 0.5)
    al1 = attn_block_diag(xavier(keys[4], (nhead, enc_num_hidden), 2 ** 0.5))
    ar1 = attn_block_diag(xavier(keys[5], (nhead, enc_num_hidden), 2 ** 0.5))
    b1 = jnp.zeros((1, nhead * enc_num_hidden), jnp.float32)
    # encoder_to_decoder: Linear(num_hidden, num_hidden, bias=False), stored [in, out]
    W_e2d = xavier(keys[6], (num_hidden, num_hidden))
    # decoder GAT layer: num_hidden -> nhead_out * in_dim, no activation
    Wd = xavier(keys[7], (num_hidden, nhead_out * in_dim), 2 ** 0.5)
    ald = attn_block_diag(xavier(keys[8], (nhead_out, in_dim), 2 ** 0.5))
    ard = attn_block_diag(xavier(keys[9], (nhead_out, in_dim), 2 ** 0.5))
    bd = jnp.zeros((1, nhead_out * in_dim), jnp.float32)
    # imp_feat parameter: xavier_normal_(gain=1.414)
    imp_feat = xavier(keys[10], (N, in_dim), 1.414)

    params = {
        "imp_feat": imp_feat,
        "enc_layers": [(W0, al0, ar0, b0), (W1, al1, ar1, b1)],
        "W_e2d": W_e2d,
        "dec_layer": (Wd, ald, ard, bd),
    }

    # graph: random dense adjacency [dst, src] with self-loops; adjacency only enters the
    # kernel through the additive non-edge mask, precomputed once per graph.
    adj = jax.random.bernoulli(keys[11], 0.3, (N, N)) | jnp.eye(N, dtype=bool)
    neg_mask = jnp.where(adj, 0.0, -1e30).astype(jnp.float32)

    # node features (NaN-free demo so both MSE terms are finite; the isnan/imputation
    # path is still executed in-kernel)
    x = jax.random.normal(keys[12], (N, in_dim), dtype=jnp.float32)

    # feature_unmask: boolean row mask (reliable rows)
    feature_unmask = jnp.arange(N) < (3 * N // 4)

    packed_params, meta = pack_premodel_params(params, feature_unmask)
    fwd = make_premodel_forward(meta, observed=observed, imputed=imputed,
                                negative_slope=negative_slope)
    loss = jax.block_until_ready(fwd(x, neg_mask, packed_params))
    loss_item = {"loss": float(loss)}   # mirrors (loss, {'loss': loss.item()})
    assert jnp.isfinite(loss)
    print("KERNEL_OK")
</pallas_src>

<mosaic_0001>
module attributes {stable_mosaic.version = 11 : i64} {
  func.func @kernel(%arg0: memref<32x16xf32, #tpu.memory_space<vmem>>, %arg1: memref<32x32xf32, #tpu.memory_space<vmem>>, %arg2: memref<248x32xf32, #tpu.memory_space<vmem>>, %arg3: memref<1x1xf32, #tpu.memory_space<vmem>>, %arg4: memref<32x32xf32, #tpu.memory_space<vmem>>) attributes {dimension_semantics = [], scalar_prefetch = 0 : i64, scratch_operands = 1 : i64, tpu.core_type = #tpu.core_type<tc>} {
    %c0 = arith.constant 0 : index
    %c0_0 = arith.constant 0 : index
    %0 = vector.load %arg0[%c0, %c0_0] : memref<32x16xf32, #tpu.memory_space<vmem>>, vector<32x16xf32>
    %c184 = arith.constant 184 : index
    %c0_1 = arith.constant 0 : index
    %1 = vector.load %arg2[%c184, %c0_1] : memref<248x32xf32, #tpu.memory_space<vmem>>, vector<32x16xf32>
    %2 = arith.cmpf one, %0, %0 : vector<32x16xf32>
    %3 = arith.select %2, %1, %0 : vector<32x16xi1>, vector<32x16xf32>
    %c0_2 = arith.constant 0 : index
    %c0_3 = arith.constant 0 : index
    %4 = vector.load %arg1[%c0_2, %c0_3] : memref<32x32xf32, #tpu.memory_space<vmem>>, vector<32x32xf32>
    %c0_4 = arith.constant 0 : index
    %c0_5 = arith.constant 0 : index
    %5 = vector.load %arg2[%c0_4, %c0_5] : memref<248x32xf32, #tpu.memory_space<vmem>>, vector<16x32xf32>
    %c16 = arith.constant 16 : index
    %c0_6 = arith.constant 0 : index
    %6 = vector.load %arg2[%c16, %c0_6] : memref<248x32xf32, #tpu.memory_space<vmem>>, vector<32x8xf32>
    %c48 = arith.constant 48 : index
    %c0_7 = arith.constant 0 : index
    %7 = vector.load %arg2[%c48, %c0_7] : memref<248x32xf32, #tpu.memory_space<vmem>>, vector<1x32xf32>
    %cst = arith.constant dense<0.000000e+00> : vector<32x32xf32>
    %8 = tpu.matmul %3, %5, %cst {dimension_numbers = #tpu.dot_dimension_numbers<[1], [0], [0], [1], [0, 0, 1, 1], [], []>} : vector<32x16xf32>, vector<16x32xf32>, vector<32x32xf32> -> vector<32x32xf32>
    %cst_8 = arith.constant dense<0.000000e+00> : vector<32x8xf32>
    %9 = tpu.matmul %8, %6, %cst_8 {dimension_numbers = #tpu.dot_dimension_numbers<[1], [0], [0], [1], [0, 0, 1, 1], [], []>} : vector<32x32xf32>, vector<32x8xf32>, vector<32x8xf32> -> vector<32x8xf32>
    %10 = vector.extract_strided_slice %9 {offsets = [0, 0], sizes = [32, 4], strides = [1, 1]} : vector<32x8xf32> to vector<32x4xf32>
    %11 = tpu.transpose %10, [1, 0] : vector<32x4xf32> -> vector<4x32xf32>
    %12 = vector.extract_strided_slice %9 {offsets = [0, 4], sizes = [32, 4], strides = [1, 1]} : vector<32x8xf32> to vector<32x4xf32>
    %13 = vector.extract_strided_slice %12 {offsets = [0, 0], sizes = [32, 1], strides = [1, 1]} : vector<32x4xf32> to vector<32x1xf32>
    %14 = vector.extract_strided_slice %11 {offsets = [0, 0], sizes = [1, 32], strides = [1, 1]} : vector<4x32xf32> to vector<1x32xf32>
    %15 = vector.broadcast %13 : vector<32x1xf32> to vector<32x32xf32>
    %16 = vector.broadcast %14 : vector<1x32xf32> to vector<32x32xf32>
    %17 = arith.addf %15, %16 : vector<32x32xf32>
    %cst_9 = arith.constant 0.000000e+00 : f32
    %18 = vector.broadcast %cst_9 : f32 to vector<32x32xf32>
    %19 = arith.cmpf ogt, %17, %18 : vector<32x32xf32>
    %cst_10 = arith.constant 2.000000e-01 : f32
    %20 = vector.broadcast %cst_10 : f32 to vector<32x32xf32>
    %21 = arith.mulf %20, %17 : vector<32x32xf32>
    %22 = arith.select %19, %17, %21 : vector<32x32xi1>, vector<32x32xf32>
    %23 = arith.addf %22, %4 : vector<32x32xf32>
    %cst_11 = arith.constant dense<0xFF800000> : vector<32xf32>
    %24 = vector.multi_reduction <maximumf>, %23, %cst_11 [1] : vector<32x32xf32> to vector<32xf32>
    %25 = vector.shape_cast %24 : vector<32xf32> to vector<32x1xf32>
    %26 = vector.broadcast %25 : vector<32x1xf32> to vector<32x32xf32>
    %27 = arith.subf %23, %26 : vector<32x32xf32>
    %28 = math.exp %27 : vector<32x32xf32>
    %cst_12 = arith.constant dense<0.000000e+00> : vector<32xf32>
    %29 = vector.multi_reduction <add>, %28, %cst_12 [1] : vector<32x32xf32> to vector<32xf32>
    %30 = vector.shape_cast %29 : vector<32xf32> to vector<32x1xf32>
    %31 = tpu.reciprocal %30 {approx = true} : vector<32x1xf32> -> vector<32x1xf32>
    %32 = vector.broadcast %31 : vector<32x1xf32> to vector<32x32xf32>
    %33 = arith.mulf %28, %32 : vector<32x32xf32>
    %34 = vector.extract_strided_slice %8 {offsets = [0, 0], sizes = [32, 8], strides = [1, 1]} : vector<32x32xf32> to vector<32x8xf32>
    %cst_13 = arith.constant dense<0.000000e+00> : vector<32x8xf32>
    %35 = tpu.matmul %33, %34, %cst_13 {dimension_numbers = #tpu.dot_dimension_numbers<[1], [0], [0], [1], [0, 0, 1, 1], [], []>} : vector<32x32xf32>, vector<32x8xf32>, vector<32x8xf32> -> vector<32x8xf32>
    %c0_14 = arith.constant 0 : index
    %c0_15 = arith.constant 0 : index
    %36 = vector.load %arg4[%c0_14, %c0_15] : memref<32x32xf32, #tpu.memory_space<vmem>>, vector<32x8xf32>
    tpu.vector_store %arg4[%c0_14, %c0_15], %35 {strides = array<i32>} : memref<32x32xf32, #tpu.memory_space<vmem>>, vector<32x8xf32>,
    %37 = vector.extract_strided_slice %12 {offsets = [0, 1], sizes = [32, 1], strides = [1, 1]} : vector<32x4xf32> to vector<32x1xf32>
    %38 = vector.extract_strided_slice %11 {offsets = [1, 0], sizes = [1, 32], strides = [1, 1]} : vector<4x32xf32> to vector<1x32xf32>
    %39 = vector.broadcast %37 : vector<32x1xf32> to vector<32x32xf32>
    %40 = vector.broadcast %38 : vector<1x32xf32> to vector<32x32xf32>
    %41 = arith.addf %39, %40 : vector<32x32xf32>
    %cst_16 = arith.constant 0.000000e+00 : f32
    %42 = vector.broadcast %cst_16 : f32 to vector<32x32xf32>
    %43 = arith.cmpf ogt, %41, %42 : vector<32x32xf32>
    %cst_17 = arith.constant 2.000000e-01 : f32
    %44 = vector.broadcast %cst_17 : f32 to vector<32x32xf32>
    %45 = arith.mulf %44, %41 : vector<32x32xf32>
    %46 = arith.select %43, %41, %45 : vector<32x32xi1>, vector<32x32xf32>
    %47 = arith.addf %46, %4 : vector<32x32xf32>
    %cst_18 = arith.constant dense<0xFF800000> : vector<32xf32>
    %48 = vector.multi_reduction <maximumf>, %47, %cst_18 [1] : vector<32x32xf32> to vector<32xf32>
    %49 = vector.shape_cast %48 : vector<32xf32> to vector<32x1xf32>
    %50 = vector.broadcast %49 : vector<32x1xf32> to vector<32x32xf32>
    %51 = arith.subf %47, %50 : vector<32x32xf32>
    %52 = math.exp %51 : vector<32x32xf32>
    %cst_19 = arith.constant dense<0.000000e+00> : vector<32xf32>
    %53 = vector.multi_reduction <add>, %52, %cst_19 [1] : vector<32x32xf32> to vector<32xf32>
    %54 = vector.shape_cast %53 : vector<32xf32> to vector<32x1xf32>
    %55 = tpu.reciprocal %54 {approx = true} : vector<32x1xf32> -> vector<32x1xf32>
    %56 = vector.broadcast %55 : vector<32x1xf32> to vector<32x32xf32>
    %57 = arith.mulf %52, %56 : vector<32x32xf32>
    %58 = vector.extract_strided_slice %8 {offsets = [0, 8], sizes = [32, 8], strides = [1, 1]} : vector<32x32xf32> to vector<32x8xf32>
    %cst_20 = arith.constant dense<0.000000e+00> : vector<32x8xf32>
    %59 = tpu.matmul %57, %58, %cst_20 {dimension_numbers = #tpu.dot_dimension_numbers<[1], [0], [0], [1], [0, 0, 1, 1], [], []>} : vector<32x32xf32>, vector<32x8xf32>, vector<32x8xf32> -> vector<32x8xf32>
    %c0_21 = arith.constant 0 : index
    %c8 = arith.constant 8 : index
    %60 = vector.load %arg4[%c0_21, %c8] : memref<32x32xf32, #tpu.memory_space<vmem>>, vector<32x8xf32>
    tpu.vector_store %arg4[%c0_21, %c8], %59 {strides = array<i32>} : memref<32x32xf32, #tpu.memory_space<vmem>>, vector<32x8xf32>,
    %61 = vector.extract_strided_slice %12 {offsets = [0, 2], sizes = [32, 1], strides = [1, 1]} : vector<32x4xf32> to vector<32x1xf32>
    %62 = vector.extract_strided_slice %11 {offsets = [2, 0], sizes = [1, 32], strides = [1, 1]} : vector<4x32xf32> to vector<1x32xf32>
    %63 = vector.broadcast %61 : vector<32x1xf32> to vector<32x32xf32>
    %64 = vector.broadcast %62 : vector<1x32xf32> to vector<32x32xf32>
    %65 = arith.addf %63, %64 : vector<32x32xf32>
    %cst_22 = arith.constant 0.000000e+00 : f32
    %66 = vector.broadcast %cst_22 : f32 to vector<32x32xf32>
    %67 = arith.cmpf ogt, %65, %66 : vector<32x32xf32>
    %cst_23 = arith.constant 2.000000e-01 : f32
    %68 = vector.broadcast %cst_23 : f32 to vector<32x32xf32>
    %69 = arith.mulf %68, %65 : vector<32x32xf32>
    %70 = arith.select %67, %65, %69 : vector<32x32xi1>, vector<32x32xf32>
    %71 = arith.addf %70, %4 : vector<32x32xf32>
    %cst_24 = arith.constant dense<0xFF800000> : vector<32xf32>
    %72 = vector.multi_reduction <maximumf>, %71, %cst_24 [1] : vector<32x32xf32> to vector<32xf32>
    %73 = vector.shape_cast %72 : vector<32xf32> to vector<32x1xf32>
    %74 = vector.broadcast %73 : vector<32x1xf32> to vector<32x32xf32>
    %75 = arith.subf %71, %74 : vector<32x32xf32>
    %76 = math.exp %75 : vector<32x32xf32>
    %cst_25 = arith.constant dense<0.000000e+00> : vector<32xf32>
    %77 = vector.multi_reduction <add>, %76, %cst_25 [1] : vector<32x32xf32> to vector<32xf32>
    %78 = vector.shape_cast %77 : vector<32xf32> to vector<32x1xf32>
    %79 = tpu.reciprocal %78 {approx = true} : vector<32x1xf32> -> vector<32x1xf32>
    %80 = vector.broadcast %79 : vector<32x1xf32> to vector<32x32xf32>
    %81 = arith.mulf %76, %80 : vector<32x32xf32>
    %82 = vector.extract_strided_slice %8 {offsets = [0, 16], sizes = [32, 8], strides = [1, 1]} : vector<32x32xf32> to vector<32x8xf32>
    %cst_26 = arith.constant dense<0.000000e+00> : vector<32x8xf32>
    %83 = tpu.matmul %81, %82, %cst_26 {dimension_numbers = #tpu.dot_dimension_numbers<[1], [0], [0], [1], [0, 0, 1, 1], [], []>} : vector<32x32xf32>, vector<32x8xf32>, vector<32x8xf32> -> vector<32x8xf32>
    %c0_27 = arith.constant 0 : index
    %c16_28 = arith.constant 16 : index
    %84 = vector.load %arg4[%c0_27, %c16_28] : memref<32x32xf32, #tpu.memory_space<vmem>>, vector<32x8xf32>
    tpu.vector_store %arg4[%c0_27, %c16_28], %83 {strides = array<i32>} : memref<32x32xf32, #tpu.memory_space<vmem>>, vector<32x8xf32>,
    %85 = vector.extract_strided_slice %12 {offsets = [0, 3], sizes = [32, 1], strides = [1, 1]} : vector<32x4xf32> to vector<32x1xf32>
    %86 = vector.extract_strided_slice %11 {offsets = [3, 0], sizes = [1, 32], strides = [1, 1]} : vector<4x32xf32> to vector<1x32xf32>
    %87 = vector.broadcast %85 : vector<32x1xf32> to vector<32x32xf32>
    %88 = vector.broadcast %86 : vector<1x32xf32> to vector<32x32xf32>
    %89 = arith.addf %87, %88 : vector<32x32xf32>
    %cst_29 = arith.constant 0.000000e+00 : f32
    %90 = vector.broadcast %cst_29 : f32 to vector<32x32xf32>
    %91 = arith.cmpf ogt, %89, %90 : vector<32x32xf32>
    %cst_30 = arith.constant 2.000000e-01 : f32
    %92 = vector.broadcast %cst_30 : f32 to vector<32x32xf32>
    %93 = arith.mulf %92, %89 : vector<32x32xf32>
    %94 = arith.select %91, %89, %93 : vector<32x32xi1>, vector<32x32xf32>
    %95 = arith.addf %94, %4 : vector<32x32xf32>
    %cst_31 = arith.constant dense<0xFF800000> : vector<32xf32>
    %96 = vector.multi_reduction <maximumf>, %95, %cst_31 [1] : vector<32x32xf32> to vector<32xf32>
    %97 = vector.shape_cast %96 : vector<32xf32> to vector<32x1xf32>
    %98 = vector.broadcast %97 : vector<32x1xf32> to vector<32x32xf32>
    %99 = arith.subf %95, %98 : vector<32x32xf32>
    %100 = math.exp %99 : vector<32x32xf32>
    %cst_32 = arith.constant dense<0.000000e+00> : vector<32xf32>
    %101 = vector.multi_reduction <add>, %100, %cst_32 [1] : vector<32x32xf32> to vector<32xf32>
    %102 = vector.shape_cast %101 : vector<32xf32> to vector<32x1xf32>
    %103 = tpu.reciprocal %102 {approx = true} : vector<32x1xf32> -> vector<32x1xf32>
    %104 = vector.broadcast %103 : vector<32x1xf32> to vector<32x32xf32>
    %105 = arith.mulf %100, %104 : vector<32x32xf32>
    %106 = vector.extract_strided_slice %8 {offsets = [0, 24], sizes = [32, 8], strides = [1, 1]} : vector<32x32xf32> to vector<32x8xf32>
    %cst_33 = arith.constant dense<0.000000e+00> : vector<32x8xf32>
    %107 = tpu.matmul %105, %106, %cst_33 {dimension_numbers = #tpu.dot_dimension_numbers<[1], [0], [0], [1], [0, 0, 1, 1], [], []>} : vector<32x32xf32>, vector<32x8xf32>, vector<32x8xf32> -> vector<32x8xf32>
    %c0_34 = arith.constant 0 : index
    %c24 = arith.constant 24 : index
    %108 = vector.load %arg4[%c0_34, %c24] : memref<32x32xf32, #tpu.memory_space<vmem>>, vector<32x8xf32>
    tpu.vector_store %arg4[%c0_34, %c24], %107 {strides = array<i32>} : memref<32x32xf32, #tpu.memory_space<vmem>>, vector<32x8xf32>,
    %c0_35 = arith.constant 0 : index
    %c0_36 = arith.constant 0 : index
    %109 = vector.load %arg4[%c0_35, %c0_36] : memref<32x32xf32, #tpu.memory_space<vmem>>, vector<32x32xf32>
    %110 = vector.broadcast %7 : vector<1x32xf32> to vector<32x32xf32>
    %111 = arith.addf %109, %110 : vector<32x32xf32>
    %cst_37 = arith.constant 0.000000e+00 : f32
    %112 = vector.broadcast %cst_37 : f32 to vector<32x32xf32>
    %113 = arith.maximumf %111, %112 : vector<32x32xf32>
    %c56 = arith.constant 56 : index
    %c0_38 = arith.constant 0 : index
    %114 = vector.load %arg2[%c56, %c0_38] : memref<248x32xf32, #tpu.memory_space<vmem>>, vector<32x32xf32>
    %c88 = arith.constant 88 : index
    %c0_39 = arith.constant 0 : index
    %115 = vector.load %arg2[%c88, %c0_39] : memref<248x32xf32, #tpu.memory_space<vmem>>, vector<32x8xf32>
    %c120 = arith.constant 120 : index
    %c0_40 = arith.constant 0 : index
    %116 = vector.load %arg2[%c120, %c0_40] : memref<248x32xf32, #tpu.memory_space<vmem>>, vector<1x32xf32>
    %cst_41 = arith.constant dense<0.000000e+00> : vector<32x32xf32>
    %117 = tpu.matmul %113, %114, %cst_41 {dimension_numbers = #tpu.dot_dimension_numbers<[1], [0], [0], [1], [0, 0, 1, 1], [], []>} : vector<32x32xf32>, vector<32x32xf32>, vector<32x32xf32> -> vector<32x32xf32>
    %cst_42 = arith.constant dense<0.000000e+00> : vector<32x8xf32>
    %118 = tpu.matmul %117, %115, %cst_42 {dimension_numbers = #tpu.dot_dimension_numbers<[1], [0], [0], [1], [0, 0, 1, 1], [], []>} : vector<32x32xf32>, vector<32x8xf32>, vector<32x8xf32> -> vector<32x8xf32>
    %119 = vector.extract_strided_slice %118 {offsets = [0, 0], sizes = [32, 4], strides = [1, 1]} : vector<32x8xf32> to vector<32x4xf32>
    %120 = tpu.transpose %119, [1, 0] : vector<32x4xf32> -> vector<4x32xf32>
    %121 = vector.extract_strided_slice %118 {offsets = [0, 4], sizes = [32, 4], strides = [1, 1]} : vector<32x8xf32> to vector<32x4xf32>
    %122 = vector.extract_strided_slice %121 {offsets = [0, 0], sizes = [32, 1], strides = [1, 1]} : vector<32x4xf32> to vector<32x1xf32>
    %123 = vector.extract_strided_slice %120 {offsets = [0, 0], sizes = [1, 32], strides = [1, 1]} : vector<4x32xf32> to vector<1x32xf32>
    %124 = vector.broadcast %122 : vector<32x1xf32> to vector<32x32xf32>
    %125 = vector.broadcast %123 : vector<1x32xf32> to vector<32x32xf32>
    %126 = arith.addf %124, %125 : vector<32x32xf32>
    %cst_43 = arith.constant 0.000000e+00 : f32
    %127 = vector.broadcast %cst_43 : f32 to vector<32x32xf32>
    %128 = arith.cmpf ogt, %126, %127 : vector<32x32xf32>
    %cst_44 = arith.constant 2.000000e-01 : f32
    %129 = vector.broadcast %cst_44 : f32 to vector<32x32xf32>
    %130 = arith.mulf %129, %126 : vector<32x32xf32>
    %131 = arith.select %128, %126, %130 : vector<32x32xi1>, vector<32x32xf32>
    %132 = arith.addf %131, %4 : vector<32x32xf32>
    %cst_45 = arith.constant dense<0xFF800000> : vector<32xf32>
    %133 = vector.multi_reduction <maximumf>, %132, %cst_45 [1] : vector<32x32xf32> to vector<32xf32>
    %134 = vector.shape_cast %133 : vector<32xf32> to vector<32x1xf32>
    %135 = vector.broadcast %134 : vector<32x1xf32> to vector<32x32xf32>
    %136 = arith.subf %132, %135 : vector<32x32xf32>
    %137 = math.exp %136 : vector<32x32xf32>
    %cst_46 = arith.constant dense<0.000000e+00> : vector<32xf32>
    %138 = vector.multi_reduction <add>, %137, %cst_46 [1] : vector<32x32xf32> to vector<32xf32>
    %139 = vector.shape_cast %138 : vector<32xf32> to vector<32x1xf32>
    %140 = tpu.reciprocal %139 {approx = true} : vector<32x1xf32> -> vector<32x1xf32>
    %141 = vector.broadcast %140 : vector<32x1xf32> to vector<32x32xf32>
    %142 = arith.mulf %137, %141 : vector<32x32xf32>
    %143 = vector.extract_strided_slice %117 {offsets = [0, 0], sizes = [32, 8], strides = [1, 1]} : vector<32x32xf32> to vector<32x8xf32>
    %cst_47 = arith.constant dense<0.000000e+00> : vector<32x8xf32>
    %144 = tpu.matmul %142, %143, %cst_47 {dimension_numbers = #tpu.dot_dimension_numbers<[1], [0], [0], [1], [0, 0, 1, 1], [], []>} : vector<32x32xf32>, vector<32x8xf32>, vector<32x8xf32> -> vector<32x8xf32>
    %c0_48 = arith.constant 0 : index
    %c0_49 = arith.constant 0 : index
    %145 = vector.load %arg4[%c0_48, %c0_49] : memref<32x32xf32, #tpu.memory_space<vmem>>, vector<32x8xf32>
    tpu.vector_store %arg4[%c0_48, %c0_49], %144 {strides = array<i32>} : memref<32x32xf32, #tpu.memory_space<vmem>>, vector<32x8xf32>,
    %146 = vector.extract_strided_slice %121 {offsets = [0, 1], sizes = [32, 1], strides = [1, 1]} : vector<32x4xf32> to vector<32x1xf32>
    %147 = vector.extract_strided_slice %120 {offsets = [1, 0], sizes = [1, 32], strides = [1, 1]} : vector<4x32xf32> to vector<1x32xf32>
    %148 = vector.broadcast %146 : vector<32x1xf32> to vector<32x32xf32>
    %149 = vector.broadcast %147 : vector<1x32xf32> to vector<32x32xf32>
    %150 = arith.addf %148, %149 : vector<32x32xf32>
    %cst_50 = arith.constant 0.000000e+00 : f32
    %151 = vector.broadcast %cst_50 : f32 to vector<32x32xf32>
    %152 = arith.cmpf ogt, %150, %151 : vector<32x32xf32>
    %cst_51 = arith.constant 2.000000e-01 : f32
    %153 = vector.broadcast %cst_51 : f32 to vector<32x32xf32>
    %154 = arith.mulf %153, %150 : vector<32x32xf32>
    %155 = arith.select %152, %150, %154 : vector<32x32xi1>, vector<32x32xf32>
    %156 = arith.addf %155, %4 : vector<32x32xf32>
    %cst_52 = arith.constant dense<0xFF800000> : vector<32xf32>
    %157 = vector.multi_reduction <maximumf>, %156, %cst_52 [1] : vector<32x32xf32> to vector<32xf32>
    %158 = vector.shape_cast %157 : vector<32xf32> to vector<32x1xf32>
    %159 = vector.broadcast %158 : vector<32x1xf32> to vector<32x32xf32>
    %160 = arith.subf %156, %159 : vector<32x32xf32>
    %161 = math.exp %160 : vector<32x32xf32>
    %cst_53 = arith.constant dense<0.000000e+00> : vector<32xf32>
    %162 = vector.multi_reduction <add>, %161, %cst_53 [1] : vector<32x32xf32> to vector<32xf32>
    %163 = vector.shape_cast %162 : vector<32xf32> to vector<32x1xf32>
    %164 = tpu.reciprocal %163 {approx = true} : vector<32x1xf32> -> vector<32x1xf32>
    %165 = vector.broadcast %164 : vector<32x1xf32> to vector<32x32xf32>
    %166 = arith.mulf %161, %165 : vector<32x32xf32>
    %167 = vector.extract_strided_slice %117 {offsets = [0, 8], sizes = [32, 8], strides = [1, 1]} : vector<32x32xf32> to vector<32x8xf32>
    %cst_54 = arith.constant dense<0.000000e+00> : vector<32x8xf32>
    %168 = tpu.matmul %166, %167, %cst_54 {dimension_numbers = #tpu.dot_dimension_numbers<[1], [0], [0], [1], [0, 0, 1, 1], [], []>} : vector<32x32xf32>, vector<32x8xf32>, vector<32x8xf32> -> vector<32x8xf32>
    %c0_55 = arith.constant 0 : index
    %c8_56 = arith.constant 8 : index
    %169 = vector.load %arg4[%c0_55, %c8_56] : memref<32x32xf32, #tpu.memory_space<vmem>>, vector<32x8xf32>
    tpu.vector_store %arg4[%c0_55, %c8_56], %168 {strides = array<i32>} : memref<32x32xf32, #tpu.memory_space<vmem>>, vector<32x8xf32>,
    %170 = vector.extract_strided_slice %121 {offsets = [0, 2], sizes = [32, 1], strides = [1, 1]} : vector<32x4xf32> to vector<32x1xf32>
    %171 = vector.extract_strided_slice %120 {offsets = [2, 0], sizes = [1, 32], strides = [1, 1]} : vector<4x32xf32> to vector<1x32xf32>
    %172 = vector.broadcast %170 : vector<32x1xf32> to vector<32x32xf32>
    %173 = vector.broadcast %171 : vector<1x32xf32> to vector<32x32xf32>
    %174 = arith.addf %172, %173 : vector<32x32xf32>
    %cst_57 = arith.constant 0.000000e+00 : f32
    %175 = vector.broadcast %cst_57 : f32 to vector<32x32xf32>
    %176 = arith.cmpf ogt, %174, %175 : vector<32x32xf32>
    %cst_58 = arith.constant 2.000000e-01 : f32
    %177 = vector.broadcast %cst_58 : f32 to vector<32x32xf32>
    %178 = arith.mulf %177, %174 : vector<32x32xf32>
    %179 = arith.select %176, %174, %178 : vector<32x32xi1>, vector<32x32xf32>
    %180 = arith.addf %179, %4 : vector<32x32xf32>
    %cst_59 = arith.constant dense<0xFF800000> : vector<32xf32>
    %181 = vector.multi_reduction <maximumf>, %180, %cst_59 [1] : vector<32x32xf32> to vector<32xf32>
    %182 = vector.shape_cast %181 : vector<32xf32> to vector<32x1xf32>
    %183 = vector.broadcast %182 : vector<32x1xf32> to vector<32x32xf32>
    %184 = arith.subf %180, %183 : vector<32x32xf32>
    %185 = math.exp %184 : vector<32x32xf32>
    %cst_60 = arith.constant dense<0.000000e+00> : vector<32xf32>
    %186 = vector.multi_reduction <add>, %185, %cst_60 [1] : vector<32x32xf32> to vector<32xf32>
    %187 = vector.shape_cast %186 : vector<32xf32> to vector<32x1xf32>
    %188 = tpu.reciprocal %187 {approx = true} : vector<32x1xf32> -> vector<32x1xf32>
    %189 = vector.broadcast %188 : vector<32x1xf32> to vector<32x32xf32>
    %190 = arith.mulf %185, %189 : vector<32x32xf32>
    %191 = vector.extract_strided_slice %117 {offsets = [0, 16], sizes = [32, 8], strides = [1, 1]} : vector<32x32xf32> to vector<32x8xf32>
    %cst_61 = arith.constant dense<0.000000e+00> : vector<32x8xf32>
    %192 = tpu.matmul %190, %191, %cst_61 {dimension_numbers = #tpu.dot_dimension_numbers<[1], [0], [0], [1], [0, 0, 1, 1], [], []>} : vector<32x32xf32>, vector<32x8xf32>, vector<32x8xf32> -> vector<32x8xf32>
    %c0_62 = arith.constant 0 : index
    %c16_63 = arith.constant 16 : index
    %193 = vector.load %arg4[%c0_62, %c16_63] : memref<32x32xf32, #tpu.memory_space<vmem>>, vector<32x8xf32>
    tpu.vector_store %arg4[%c0_62, %c16_63], %192 {strides = array<i32>} : memref<32x32xf32, #tpu.memory_space<vmem>>, vector<32x8xf32>,
    %194 = vector.extract_strided_slice %121 {offsets = [0, 3], sizes = [32, 1], strides = [1, 1]} : vector<32x4xf32> to vector<32x1xf32>
    %195 = vector.extract_strided_slice %120 {offsets = [3, 0], sizes = [1, 32], strides = [1, 1]} : vector<4x32xf32> to vector<1x32xf32>
    %196 = vector.broadcast %194 : vector<32x1xf32> to vector<32x32xf32>
    %197 = vector.broadcast %195 : vector<1x32xf32> to vector<32x32xf32>
    %198 = arith.addf %196, %197 : vector<32x32xf32>
    %cst_64 = arith.constant 0.000000e+00 : f32
    %199 = vector.broadcast %cst_64 : f32 to vector<32x32xf32>
    %200 = arith.cmpf ogt, %198, %199 : vector<32x32xf32>
    %cst_65 = arith.constant 2.000000e-01 : f32
    %201 = vector.broadcast %cst_65 : f32 to vector<32x32xf32>
    %202 = arith.mulf %201, %198 : vector<32x32xf32>
    %203 = arith.select %200, %198, %202 : vector<32x32xi1>, vector<32x32xf32>
    %204 = arith.addf %203, %4 : vector<32x32xf32>
    %cst_66 = arith.constant dense<0xFF800000> : vector<32xf32>
    %205 = vector.multi_reduction <maximumf>, %204, %cst_66 [1] : vector<32x32xf32> to vector<32xf32>
    %206 = vector.shape_cast %205 : vector<32xf32> to vector<32x1xf32>
    %207 = vector.broadcast %206 : vector<32x1xf32> to vector<32x32xf32>
    %208 = arith.subf %204, %207 : vector<32x32xf32>
    %209 = math.exp %208 : vector<32x32xf32>
    %cst_67 = arith.constant dense<0.000000e+00> : vector<32xf32>
    %210 = vector.multi_reduction <add>, %209, %cst_67 [1] : vector<32x32xf32> to vector<32xf32>
    %211 = vector.shape_cast %210 : vector<32xf32> to vector<32x1xf32>
    %212 = tpu.reciprocal %211 {approx = true} : vector<32x1xf32> -> vector<32x1xf32>
    %213 = vector.broadcast %212 : vector<32x1xf32> to vector<32x32xf32>
    %214 = arith.mulf %209, %213 : vector<32x32xf32>
    %215 = vector.extract_strided_slice %117 {offsets = [0, 24], sizes = [32, 8], strides = [1, 1]} : vector<32x32xf32> to vector<32x8xf32>
    %cst_68 = arith.constant dense<0.000000e+00> : vector<32x8xf32>
    %216 = tpu.matmul %214, %215, %cst_68 {dimension_numbers = #tpu.dot_dimension_numbers<[1], [0], [0], [1], [0, 0, 1, 1], [], []>} : vector<32x32xf32>, vector<32x8xf32>, vector<32x8xf32> -> vector<32x8xf32>
    %c0_69 = arith.constant 0 : index
    %c24_70 = arith.constant 24 : index
    %217 = vector.load %arg4[%c0_69, %c24_70] : memref<32x32xf32, #tpu.memory_space<vmem>>, vector<32x8xf32>
    tpu.vector_store %arg4[%c0_69, %c24_70], %216 {strides = array<i32>} : memref<32x32xf32, #tpu.memory_space<vmem>>, vector<32x8xf32>,
    %c0_71 = arith.constant 0 : index
    %c0_72 = arith.constant 0 : index
    %218 = vector.load %arg4[%c0_71, %c0_72] : memref<32x32xf32, #tpu.memory_space<vmem>>, vector<32x32xf32>
    %219 = vector.broadcast %116 : vector<1x32xf32> to vector<32x32xf32>
    %220 = arith.addf %218, %219 : vector<32x32xf32>
    %cst_73 = arith.constant 0.000000e+00 : f32
    %221 = vector.broadcast %cst_73 : f32 to vector<32x32xf32>
    %222 = arith.maximumf %220, %221 : vector<32x32xf32>
    %c128 = arith.constant 128 : index
    %c0_74 = arith.constant 0 : index
    %223 = vector.load %arg2[%c128, %c0_74] : memref<248x32xf32, #tpu.memory_space<vmem>>, vector<32x16xf32>
    %c160 = arith.constant 160 : index
    %c0_75 = arith.constant 0 : index
    %224 = vector.load %arg2[%c160, %c0_75] : memref<248x32xf32, #tpu.memory_space<vmem>>, vector<16x2xf32>
    %c176 = arith.constant 176 : index
    %c0_76 = arith.constant 0 : index
    %225 = vector.load %arg2[%c176, %c0_76] : memref<248x32xf32, #tpu.memory_space<vmem>>, vector<1x16xf32>
    %cst_77 = arith.constant dense<0.000000e+00> : vector<32x16xf32>
    %226 = tpu.matmul %222, %223, %cst_77 {dimension_numbers = #tpu.dot_dimension_numbers<[1], [0], [0], [1], [0, 0, 1, 1], [], []>} : vector<32x32xf32>, vector<32x16xf32>, vector<32x16xf32> -> vector<32x16xf32>
    %cst_78 = arith.constant dense<0.000000e+00> : vector<32x2xf32>
    %227 = tpu.matmul %226, %224, %cst_78 {dimension_numbers = #tpu.dot_dimension_numbers<[1], [0], [0], [1], [0, 0, 1, 1], [], []>} : vector<32x16xf32>, vector<16x2xf32>, vector<32x2xf32> -> vector<32x2xf32>
    %228 = vector.extract_strided_slice %227 {offsets = [0, 0], sizes = [32, 1], strides = [1, 1]} : vector<32x2xf32> to vector<32x1xf32>
    %229 = tpu.transpose %228, [1, 0] : vector<32x1xf32> -> vector<1x32xf32>
    %230 = vector.extract_strided_slice %227 {offsets = [0, 1], sizes = [32, 1], strides = [1, 1]} : vector<32x2xf32> to vector<32x1xf32>
    %231 = vector.broadcast %230 : vector<32x1xf32> to vector<32x32xf32>
    %232 = vector.broadcast %229 : vector<1x32xf32> to vector<32x32xf32>
    %233 = arith.addf %231, %232 : vector<32x32xf32>
    %cst_79 = arith.constant 0.000000e+00 : f32
    %234 = vector.broadcast %cst_79 : f32 to vector<32x32xf32>
    %235 = arith.cmpf ogt, %233, %234 : vector<32x32xf32>
    %cst_80 = arith.constant 2.000000e-01 : f32
    %236 = vector.broadcast %cst_80 : f32 to vector<32x32xf32>
    %237 = arith.mulf %236, %233 : vector<32x32xf32>
    %238 = arith.select %235, %233, %237 : vector<32x32xi1>, vector<32x32xf32>
    %239 = arith.addf %238, %4 : vector<32x32xf32>
    %cst_81 = arith.constant dense<0xFF800000> : vector<32xf32>
    %240 = vector.multi_reduction <maximumf>, %239, %cst_81 [1] : vector<32x32xf32> to vector<32xf32>
    %241 = vector.shape_cast %240 : vector<32xf32> to vector<32x1xf32>
    %242 = vector.broadcast %241 : vector<32x1xf32> to vector<32x32xf32>
    %243 = arith.subf %239, %242 : vector<32x32xf32>
    %244 = math.exp %243 : vector<32x32xf32>
    %cst_82 = arith.constant dense<0.000000e+00> : vector<32xf32>
    %245 = vector.multi_reduction <add>, %244, %cst_82 [1] : vector<32x32xf32> to vector<32xf32>
    %246 = vector.shape_cast %245 : vector<32xf32> to vector<32x1xf32>
    %247 = tpu.reciprocal %246 {approx = true} : vector<32x1xf32> -> vector<32x1xf32>
    %248 = vector.broadcast %247 : vector<32x1xf32> to vector<32x32xf32>
    %249 = arith.mulf %244, %248 : vector<32x32xf32>
    %cst_83 = arith.constant dense<0.000000e+00> : vector<32x16xf32>
    %250 = tpu.matmul %249, %226, %cst_83 {dimension_numbers = #tpu.dot_dimension_numbers<[1], [0], [0], [1], [0, 0, 1, 1], [], []>} : vector<32x32xf32>, vector<32x16xf32>, vector<32x16xf32> -> vector<32x16xf32>
    %251 = vector.broadcast %225 : vector<1x16xf32> to vector<32x16xf32>
    %252 = arith.addf %250, %251 : vector<32x16xf32>
    %253 = arith.subf %0, %252 : vector<32x16xf32>
    %254 = arith.mulf %253, %253 : vector<32x16xf32>
    %c216 = arith.constant 216 : index
    %c0_84 = arith.constant 0 : index
    %255 = vector.load %arg2[%c216, %c0_84] : memref<248x32xf32, #tpu.memory_space<vmem>>, vector<32x1xf32>
    %cst_85 = arith.constant dense<0.000000e+00> : vector<32xf32>
    %256 = vector.multi_reduction <add>, %254, %cst_85 [1] : vector<32x16xf32> to vector<32xf32>
    %257 = vector.shape_cast %256 : vector<32xf32> to vector<32x1xf32>
    %cst_86 = arith.constant dense<0.000000e+00> : vector<1xf32>
    %258 = vector.multi_reduction <add>, %257, %cst_86 [0] : vector<32x1xf32> to vector<1xf32>
    %259 = vector.shape_cast %258 : vector<1xf32> to vector<1x1xf32>
    %260 = arith.mulf %257, %255 : vector<32x1xf32>
    %cst_87 = arith.constant dense<0.000000e+00> : vector<1xf32>
    %261 = vector.multi_reduction <add>, %260, %cst_87 [0] : vector<32x1xf32> to vector<1xf32>
    %262 = vector.shape_cast %261 : vector<1xf32> to vector<1x1xf32>
    %263 = arith.subf %259, %262 : vector<1x1xf32>
    %cst_88 = arith.constant dense<0.000000e+00> : vector<1xf32>
    %264 = vector.multi_reduction <add>, %255, %cst_88 [0] : vector<32x1xf32> to vector<1xf32>
    %265 = vector.shape_cast %264 : vector<1xf32> to vector<1x1xf32>
    %cst_89 = arith.constant 1.600000e+01 : f32
    %266 = vector.broadcast %cst_89 : f32 to vector<1x1xf32>
    %267 = arith.mulf %265, %266 : vector<1x1xf32>
    %cst_90 = arith.constant 1.000000e+00 : f32
    %268 = vector.broadcast %cst_90 : f32 to vector<1x1xf32>
    %269 = arith.maximumf %267, %268 : vector<1x1xf32>
    %cst_91 = arith.constant 3.200000e+01 : f32
    %270 = vector.broadcast %cst_91 : f32 to vector<1x1xf32>
    %271 = arith.subf %270, %265 : vector<1x1xf32>
    %cst_92 = arith.constant 1.600000e+01 : f32
    %272 = vector.broadcast %cst_92 : f32 to vector<1x1xf32>
    %273 = arith.mulf %271, %272 : vector<1x1xf32>
    %cst_93 = arith.constant 1.000000e+00 : f32
    %274 = vector.broadcast %cst_93 : f32 to vector<1x1xf32>
    %275 = arith.maximumf %273, %274 : vector<1x1xf32>
    %cst_94 = arith.constant 1.000000e+00 : f32
    %276 = vector.broadcast %cst_94 : f32 to vector<1x1xf32>
    %277 = arith.mulf %276, %262 : vector<1x1xf32>
    %278 = arith.divf %277, %269 : vector<1x1xf32>
    %cst_95 = arith.constant 5.000000e-01 : f32
    %279 = vector.broadcast %cst_95 : f32 to vector<1x1xf32>
    %280 = arith.mulf %279, %263 : vector<1x1xf32>
    %281 = arith.divf %280, %275 : vector<1x1xf32>
    %282 = arith.addf %278, %281 : vector<1x1xf32>
    %c0_96 = arith.constant 0 : index
    %c0_97 = arith.constant 0 : index
    %283 = vector.load %arg3[%c0_96, %c0_97] : memref<1x1xf32, #tpu.memory_space<vmem>>, vector<1x1xf32>
    tpu.vector_store %arg3[%c0_96, %c0_97], %282 {strides = array<i32>} : memref<1x1xf32, #tpu.memory_space<vmem>>, vector<1x1xf32>,
    return
  }
}

</mosaic_0001>

<bundles_post_ra>
// kernel: fwd.1
= control target key start
LH: loop header
LB: loop body
LE: loop exit
PB: predicated region body
PF: predicated region fallthrough
CT: control target
= control target key end

     0   :  { %vm42_vm1 = vcmask 130048   ;;  %s3017_s0 = inlined_call_operand.vmem [shape: f32[32,16], index: 0, kind: input, shape index: {}]   ;;  %s3018_s1 = inlined_call_operand.vmem [shape: f32[32,32], index: 1, kind: input, shape index: {}]   ;;  %s3019_s2 = inlined_call_operand.vmem [shape: f32[248,32], index: 2, kind: input, shape index: {}]   ;;  %s3020_s3 = inlined_call_operand.hbm [shape: f32[1,1], index: 3, kind: output, shape index: {}]  }
   0x1   :  { %v36_v0 = vld [vmem:[%s3019_s2 + $0x8] sm:$0xff]  ;;  %v35_v1 = vld [vmem:[%s3019_s2] sm:$0xff]  ;;  %v19_v3 = vld [vmem:[%s3019_s2 + $0xb8] sm:$0xff] }
   0x2   :  { %v15_v2 = vld [vmem:[%s3017_s0] sm:$0xff]  ;;  %69 = vmatpush.msra.mxu0 %v36_v0  ;;  %v16_v5 = vld [vmem:[%s3017_s0 + $0x8] sm:$0xff]  ;;  %v38_v8 = vld [vmem:[%s3019_s2 + $0x18] sm:$0xff] }
   0x3   :  { %vm23_vm0 = vcmp.ne.f32.partialorder %v15_v2, %v15_v2  ;;  %v40_v6 = vld [vmem:[%s3019_s2 + $0x28] sm:$0xff]  ;;  %v39_v7 = vld [vmem:[%s3019_s2 + $0x20] sm:$0xff] }
   0x4   :  { %v27_v4 = vsel %vm23_vm0, %v19_v3, %v15_v2  ;;  %70 = vmatpush.msra.mxu0 %v35_v1  ;;  %109 = vmatpush.msra.mxu1 %v40_v6 }
   0x5   :  { %1863 = vmatmul.msk.f32.vlgmr.msra.gmra.mxu0 %vm42_vm1, %v27_v4  ;;  %1923 = vmatpush.msra.mxu3 %v40_v6 }
   0x6   :  { %8 = vsyncpa [#allocation4], 0  ;;  %v20_v9 = vld [vmem:[%s3019_s2 + $0xc0] sm:$0xff]  ;;  %vm24_vm2 = vcmp.ne.f32.partialorder %v16_v5, %v16_v5  ;;  %110 = vmatpush.msra.mxu1 %v39_v7  ;;  %v17_v11 = vld [vmem:[%s3017_s0 + $0x10] sm:$0xff]  ;;  %vm84_vm5 = vcmask 261120   ;;  %s2219_s13 = smov 120  }
   0x7   :  { %1924 = vmatpush.msra.mxu3 %v39_v7  ;;  %v28_v10 = vsel %vm24_vm2, %v20_v9, %v16_v5  ;;  %v21_v12 = vld [vmem:[%s3019_s2 + $0xc8] sm:$0xff]  ;;  %vm25_vm3 = vcmp.ne.f32.partialorder %v17_v11, %v17_v11  ;;  %v18_v14 = vld [vmem:[%s3017_s0 + $0x18] sm:$0xff]  ;;  %v22_v15 = vld [vmem:[%s3019_s2 + $0xd0] sm:$0xff]  ;;  %s2220_s14 = smov 112   ;;  %s2221_s15 = smov 104   ;;  %v2222_v24 = vmov 7  }
   0x8   :  { %111 = vmatpush.msra.mxu1 %v38_v8  ;;  %v29_v13 = vsel %vm25_vm3, %v21_v12, %v17_v11  ;;  %vm26_vm4 = vcmp.ne.f32.partialorder %v18_v14, %v18_v14  ;;  %v37_v17 = vld [vmem:[%s3019_s2 + $0x10] sm:$0xff]  ;;  %1967 = vset.pattern.permute.xlu2 %v2222_v24  ;;  %v2223_v25 = vmov 6   ;;  %v2224_v26 = vmov 4   ;;  %v31_v62 = vld [vmem:[%s3018_s1] sm:$0xff]  ;;  %v2346_v63 = vld [vmem:[%s3018_s1 + $0x18] sm:$0xff]  ;;  %s2226_s24 = smov 16  }
   0x9   :  { %1925 = vmatpush.msra.mxu3 %v38_v8  ;;  %v30_v16 = vsel %vm26_vm4, %v22_v15, %v18_v14  ;;  %1966 = vset.pattern.permute.xlu1 %v2223_v25  ;;  %v2225_v37 = vmov 5   ;;  %s2227_s25 = smov 24   ;;  %s2228_s26 = smov 8  }
   0xa   :  { %112 = vmatpush.msra.mxu1 %v37_v17  ;;  %1964 = vset.pattern.permute.xlu0 %v2224_v26 }
   0xb   :  { %1926 = vmatpush.msra.mxu3 %v37_v17 }
   0xd   :  { %1864 = vmatmul.msk.f32.gmra.mxu0 %vm42_vm1, %v28_v10 }
  0x15   :  { %1865 = vmatmul.msk.f32.gmra.mxu0 %vm42_vm1, %v29_v13 }
  0x1d   :  { %1866 = vmatmul.msk.f32.gmra.mxu0 %vm42_vm1, %v30_v16 }
  0x82   :  { %v72_v18 = vpop.f32.mrf.mxu0 }
  0x83   :  { %1867 = vmatmul.msk.f32.vlgmr.msra.gmra.mxu1 %vm84_vm5, %v72_v18 }
  0x8a   :  { %v75_v19 = vpop.f32.mrf.mxu0 }
  0x8b   :  { %1868 = vmatmul.msk.f32.vlgmr.msra.gmra.mxu3 %vm84_vm5, %v75_v19  ;;  %v2299_v20 = vpack.i.bf16 %v72_v18, %v75_v19 }
  0x8d   :  { %1945 = vrot.lane.b32.xlu1 %v2299_v20, %s2219_s13 }
  0x92   :  { %v78_v21 = vpop.f32.mrf.mxu0 }
  0x93   :  { %1869 = vmatmul.msk.f32.gmra.mxu3 %vm84_vm5, %v78_v21 }
  0x9a   :  { %v81_v22 = vpop.f32.mrf.mxu0 }
  0x9b   :  { %267 = vmatpush.msrb.mxu1 %v81_v22  ;;  %1927 = vmatpush.msra.mxu2 %v81_v22  ;;  %v1954_v23 = vpack.i.bf16 %v78_v21, %v81_v22 }
  0x9c   :  { %1870 = vmatmul.msk.f32.gmra.mxu3 %vm84_vm5, %v81_v22 }
  0x9d   :  { %1955 = vrot.lane.b32.xlu0 %v1954_v23, %s2220_s14  ;;  %1950 = vrot.lane.b32.xlu2 %v1954_v23, %s2219_s13 }
  0x9e   :  { %268 = vmatpush.msrb.mxu1 %v78_v21  ;;  %1928 = vmatpush.msra.mxu2 %v78_v21 }
  0xa0   :  { %269 = vmatpush.msrb.mxu1 %v75_v19  ;;  %1929 = vmatpush.msra.mxu2 %v75_v19  ;;  %v32_v19 = vld [vmem:[%s3018_s1 + $0x8] sm:$0xff] }
  0xa2   :  { %270 = vmatpush.msrb.mxu1 %v72_v18  ;;  %1930 = vmatpush.msra.mxu2 %v72_v18 }
  0xa5   :  { %1960 = vrot.lane.b32.xlu2 %v1954_v23, %s2221_s15 }
  0xf7   :  { %v1951_v27 = vpop.permute.xlu2 %1950 }
  0xf8   :  { %v1952_v28 = vunpack.i.l.bf16 %v1951_v27  ;;  %v1953_v29 = vunpack.i.h.bf16 %v1951_v27 }
  0xfa   :  { %406 = vmatpush.msrb.mxu3 %v1952_v28 }
  0xfc   :  { %407 = vmatpush.msrb.mxu3 %v1953_v29 }
  0xff   :  { %v1946_v30 = vpop.permute.xlu1 %1945  ;;  %v1961_v31 = vpop.permute.xlu2 %1960 }
 0x100   :  { %v1962_v32 = vunpack.i.l.bf16 %v1961_v31  ;;  %v114_v33 = vpop.f32.mrf.mxu1  ;;  %v1947_v34 = vunpack.i.l.bf16 %v1946_v30  ;;  %v1948_v35 = vunpack.i.h.bf16 %v1946_v30  ;;  %v1963_v36 = vunpack.i.h.bf16 %v1961_v31 }
 0x101   :  { %445 = vperm.xlu1 %1966, %v114_v33   ;;  %160 = vperm.xlu0 %1964, %v114_v33  }
 0x102   :  { %600 = vperm.xlu2 %1967, %v114_v33   ;;  %408 = vmatpush.msrb.mxu3 %v1947_v34 }
 0x103   :  { %716 = vmatpush.msra.mxu1 %v1962_v32 }
 0x104   :  { %409 = vmatpush.msrb.mxu3 %v1948_v35  ;;  %v2381_v35 = vld [vmem:[%s3018_s1 + $0x10] sm:$0xff] }
 0x105   :  { %717 = vmatpush.msra.mxu1 %v1963_v36 }
 0x109   :  { %1965 = vset.pattern.permute.xlu0 %v2225_v37  ;;  %1968 = vset.pattern.permute.xlu1 %v2225_v37 }
 0x10a   :  { %290 = vperm.xlu0 %1965, %v114_v33   ;;  %1969 = vset.pattern.permute.xlu2 %v2223_v25 }
 0x10e   :  { %v117_v38 = vpop.f32.mrf.mxu3 }
 0x10f   :  { %294 = vperm.xlu1 %1968, %v117_v38   ;;  %v1956_v39 = vpop.permute.xlu0 %1955  ;;  %449 = vperm.xlu2 %1969, %v117_v38  }
 0x110   :  { %v1957_v40 = vunpack.i.l.bf16 %v1956_v39  ;;  %v1958_v41 = vunpack.i.h.bf16 %v1956_v39 }
 0x112   :  { %561 = vmatpush.msrb.mxu0 %v1957_v40  ;;  %1974 = vset.pattern.permute.xlu0 %v2224_v26 }
 0x114   :  { %562 = vmatpush.msrb.mxu0 %v1958_v41 }
 0x116   :  { %v120_v42 = vpop.f32.mrf.mxu3 }
 0x117   :  { %298 = vperm.xlu1 %1968, %v120_v42   ;;  %170 = vperm.xlu0 %1974, %v120_v42  }
 0x118   :  { %1970 = vset.pattern.permute.xlu2 %v2222_v24 }
 0x119   :  { %604 = vperm.xlu2 %1970, %v117_v38  }
 0x11f   :  { %1972 = vset.pattern.permute.xlu1 %v2223_v25  ;;  %v123_v43 = vpop.f32.mrf.mxu3 }
 0x120   :  { %453 = vperm.xlu1 %1972, %v120_v42  }
 0x121   :  { %1971 = vset.pattern.permute.xlu2 %v2224_v26 }
 0x122   :  { %165 = vperm.xlu2 %1971, %v117_v38  }
 0x128   :  { %1973 = vset.pattern.permute.xlu1 %v2222_v24 }
 0x129   :  { %608 = vperm.xlu1 %1973, %v120_v42  }
 0x12a   :  { %1975 = vset.pattern.permute.xlu2 %v2225_v37 }
 0x12b   :  { %302 = vperm.xlu2 %1975, %v123_v43  }
 0x131   :  { %612 = vperm.xlu1 %1973, %v123_v43  }
 0x133   :  { %1976 = vset.pattern.permute.xlu2 %v2223_v25 }
 0x134   :  { %457 = vperm.xlu2 %1976, %v123_v43  }
 0x139   :  { %126 = vxpose.xlu0.b32.start [1/4] (short) (narrow) %v114_v33, 8  ;;  %1977 = vset.pattern.permute.xlu1 %v2224_v26 }
 0x13a   :  { %175 = vperm.xlu1 %1977, %v123_v43  }
 0x141   :  { %127 = vxpose.xlu0.b32.cont [2/4] (short) (narrow) %v117_v38, 8 }
 0x142   :  { %2009 = vset.pattern.permute.xlu1 %v2225_v37 }
 0x149   :  { %128 = vxpose.xlu0.b32.cont [3/4] (short) (narrow) %v120_v42, 8 }
 0x151   :  { %129 = vxpose.xlu0.b32.end [4/4] (short) (narrow) %v123_v43, 8 }
 0x15c   :  { %v601_v3 = vpop.permute.xlu2 %600 }
 0x169   :  { %v450_v23 = vpop.permute.xlu2 %449 }
 0x173   :  { %v446_v44 = vpop.permute.xlu1 %445  ;;  %v161_v47 = vpop.permute.xlu0 %160 }
 0x174   :  { %v605_v42 = vpop.permute.xlu2 %604 }
 0x17c   :  { %v291_v49 = vpop.permute.xlu0 %290 }
 0x181   :  { %v295_v45 = vpop.permute.xlu1 %294 }
 0x189   :  { %v2324_v46 = vpop.permute.xlu1 %298  ;;  %v171_v51 = vpop.permute.xlu0 %170 }
 0x192   :  { %v454_v48 = vpop.permute.xlu1 %453 }
 0x19b   :  { %v2326_v50 = vpop.permute.xlu1 %608 }
 0x1a3   :  { %v2328_v52 = vpop.permute.xlu1 %612 }
 0x1ac   :  { %v176_v57 = vpop.permute.xlu1 %175 }
 0x1b8   :  { %2008 = vset.pattern.permute.xlu0 %v2222_v24 }
 0x1dd   :  { %v142_v53 = vpop.trf.xlu0 }
 0x1de   :  { %v2330_v54 = vperm.slane %v142_v53, 0  ;;  %v2332_v55 = vperm.slane %v142_v53, 1  ;;  %v2334_v56 = vperm.slane %v142_v53, 2  ;;  %v2349_v4 = vperm.slane %v142_v53, 3  ;;  %v166_v53 = vpop.permute.xlu2 %165 }
 0x1e0   :  { %v306_v58 = vadd.f32 %v2332_v55, %v291_v49  ;;  %v182_v59 = vadd.f32 %v2330_v54, %v176_v57  ;;  %v179_v60 = vadd.f32 %v2330_v54, %v161_v47  ;;  %v461_v61 = vadd.f32 %v2334_v56, %v446_v44 }
 0x1e1   :  { %v307_v0 = vadd.f32 %v2332_v55, %v295_v45  ;;  %v616_v18 = vadd.f32 %v2349_v4, %v601_v3  ;;  %v463_v22 = vadd.f32 %v2334_v56, %v454_v48  ;;  %v462_v34 = vadd.f32 %v2334_v56, %v450_v23 }
 0x1e2   :  { %vm310_vm6 = vcmp.gt.f32.partialorder %v306_v58, 0.0  ;;  %v314_v1 = vmul.f32 0.2, %v306_v58  ;;  %vm186_vm7 = vcmp.gt.f32.partialorder %v182_v59, 0.0  ;;  %v190_v2 = vmul.f32 0.2, %v182_v59 }
 0x1e3   :  { %vm183_vm8 = vcmp.gt.f32.partialorder %v179_v60, 0.0  ;;  %v187_v5 = vmul.f32 0.2, %v179_v60  ;;  %vm465_vm9 = vcmp.gt.f32.partialorder %v461_v61, 0.0  ;;  %v469_v8 = vmul.f32 0.2, %v461_v61 }
 0x1e4   :  { %v318_v6 = vsel %vm310_vm6, %v306_v58, %v314_v1  ;;  %v194_v7 = vsel %vm186_vm7, %v182_v59, %v190_v2  ;;  %v315_v12 = vmul.f32 0.2, %v307_v0  ;;  %vm311_vm10 = vcmp.gt.f32.partialorder %v307_v0, 0.0 }
 0x1e5   :  { %v2351_v9 = vadd.f32 %v318_v6, %v31_v62  ;;  %v2354_v10 = vadd.f32 %v194_v7, %v2346_v63  ;;  %v191_v11 = vsel %vm183_vm8, %v179_v60, %v187_v5  ;;  %v473_v17 = vsel %vm465_vm9, %v461_v61, %v469_v8 }
 0x1e6   :  { %v2356_v13 = vadd.f32 %v191_v11, %v31_v62  ;;  %v319_v21 = vsel %vm311_vm10, %v307_v0, %v315_v12  ;;  %v2369_v27 = vadd.f32 %v473_v17, %v31_v62  ;;  %v624_v29 = vmul.f32 0.2, %v616_v18 }
 0x1e7   :  { %v326_v14 = vsel %vm84_vm5, %v2351_v9, -inf  ;;  %v208_v15 = vsel %vm84_vm5, %v2354_v10, -inf  ;;  %v2371_v28 = vadd.f32 %v319_v21, %v32_v19  ;;  %vm620_vm11 = vcmp.gt.f32.partialorder %v616_v18, 0.0 }
 0x1e8   :  { %327 = vmax.xlane.f32.xlu2 %v326_v14  ;;  %209 = vmax.xlane.f32.xlu0 %v208_v15  ;;  %v199_v16 = vsel %vm84_vm5, %v2356_v13, -inf  ;;  %v471_v30 = vmul.f32 0.2, %v463_v22  ;;  %vm467_vm12 = vcmp.gt.f32.partialorder %v463_v22, 0.0  ;;  %v481_v31 = vsel %vm84_vm5, %v2369_v27, -inf }
 0x1e9   :  { %200 = vmax.xlane.f32.xlu1 %v199_v16  ;;  %v329_v32 = vsel %vm84_vm5, %v2371_v28, -inf  ;;  %v628_v33 = vsel %vm620_vm11, %v616_v18, %v624_v29  ;;  %v470_v40 = vmul.f32 0.2, %v462_v34  ;;  %v2389_v41 = vadd.f32 %v2330_v54, %v171_v51 }
 0x1ea   :  { %v475_v36 = vsel %vm467_vm12, %v463_v22, %v471_v30  ;;  %v2383_v38 = vadd.f32 %v628_v33, %v31_v62  ;;  %vm466_vm13 = vcmp.gt.f32.partialorder %v462_v34, 0.0  ;;  %v617_v47 = vadd.f32 %v2349_v4, %v605_v42 }
 0x1eb   :  { %v2386_v39 = vadd.f32 %v475_v36, %v2381_v35  ;;  %v474_v45 = vsel %vm466_vm13, %v462_v34, %v470_v40  ;;  %v180_v58 = vadd.f32 %v2330_v54, %v166_v53  ;;  %v308_v0 = vadd.f32 %v2332_v55, %v2324_v46  ;;  %v303_v46 = vpop.permute.xlu2 %302 }
 0x1ec   :  { %v636_v43 = vsel %vm84_vm5, %v2383_v38, -inf  ;;  %v2396_v48 = vadd.f32 %v474_v45, %v32_v19  ;;  %v625_v49 = vmul.f32 0.2, %v617_v47  ;;  %vm621_vm14 = vcmp.gt.f32.partialorder %v617_v47, 0.0 }
 0x1ed   :  { %v487_v44 = vsel %vm84_vm5, %v2386_v39, -inf  ;;  %v188_v60 = vmul.f32 0.2, %v180_v58  ;;  %vm184_vm15 = vcmp.gt.f32.partialorder %v180_v58, 0.0  ;;  %v316_v2 = vmul.f32 0.2, %v308_v0 }
 0x1ee   :  { %v484_v51 = vsel %vm84_vm5, %v2396_v48, -inf  ;;  %v629_v57 = vsel %vm621_vm14, %v617_v47, %v625_v49  ;;  %vm312_vm0 = vcmp.gt.f32.partialorder %v308_v0, 0.0  ;;  %v618_v5 = vadd.f32 %v2349_v4, %v2326_v50 }
 0x1ef   :  { %v2401_v59 = vadd.f32 %v629_v57, %v32_v19  ;;  %v192_v62 = vsel %vm184_vm15, %v180_v58, %v188_v60  ;;  %v320_v54 = vsel %vm312_vm0, %v308_v0, %v316_v2  ;;  %v309_v12 = vadd.f32 %v2332_v55, %v303_v46 }
 0x1f0   :  { %482 = vmax.xlane.f32.xlu2 %v481_v31  ;;  %v2407_v1 = vadd.f32 %v192_v62, %v32_v19  ;;  %v2416_v6 = vadd.f32 %v320_v54, %v2381_v35  ;;  %v626_v7 = vmul.f32 0.2, %v618_v5  ;;  %vm622_vm2 = vcmp.gt.f32.partialorder %v618_v5, 0.0 }
 0x1f1   :  { %330 = vmax.xlane.f32.xlu1 %v329_v32  ;;  %v639_v61 = vsel %vm84_vm5, %v2401_v59, -inf  ;;  %v317_v50 = vmul.f32 0.2, %v309_v12  ;;  %vm313_vm3 = vcmp.gt.f32.partialorder %v309_v12, 0.0  ;;  %v619_v23 = vadd.f32 %v2349_v4, %v2328_v52 }
 0x1f2   :  { %v202_v3 = vsel %vm84_vm5, %v2407_v1, -inf  ;;  %v332_v8 = vsel %vm84_vm5, %v2416_v6, -inf  ;;  %v630_v11 = vsel %vm622_vm2, %v618_v5, %v626_v7  ;;  %v189_v32 = vmul.f32 0.2, %v2389_v41 }
 0x1f3   :  { %v2422_v14 = vadd.f32 %v630_v11, %v2381_v35  ;;  %v458_v15 = vpop.permute.xlu2 %457  ;;  %v321_v17 = vsel %vm313_vm3, %v309_v12, %v317_v50  ;;  %v627_v30 = vmul.f32 0.2, %v619_v23  ;;  %vm623_vm6 = vcmp.gt.f32.partialorder %v619_v23, 0.0 }
 0x1f4   :  { %v464_v18 = vadd.f32 %v2334_v56, %v458_v15  ;;  %v2428_v19 = vadd.f32 %v321_v17, %v2346_v63  ;;  %vm185_vm7 = vcmp.gt.f32.partialorder %v2389_v41, 0.0  ;;  %vm284_vm8 = vcmask 64512  }
 0x1f5   :  { %v642_v16 = vsel %vm84_vm5, %v2422_v14, -inf  ;;  %v631_v31 = vsel %vm623_vm6, %v619_v23, %v627_v30  ;;  %v193_v34 = vsel %vm185_vm7, %v2389_v41, %v189_v32  ;;  %vm439_vm9 = vcmask 130112  }
 0x1f6   :  { %v472_v21 = vmul.f32 0.2, %v464_v18  ;;  %vm468_vm4 = vcmp.gt.f32.partialorder %v464_v18, 0.0  ;;  %v335_v55 = vsel %vm84_vm5, %v2428_v19, -inf  ;;  %v2442_v33 = vadd.f32 %v631_v31, %v2346_v63 }
 0x1f7   :  { %v2448_v4 = vadd.f32 %v193_v34, %v2381_v35  ;;  %vm594_vm10 = vcmask 195712   ;;  %vm749_vm11 = vcmask 261312  }
 0x1f8   :  { %637 = vmax.xlane.f32.xlu2 %v636_v43  ;;  %v476_v22 = vsel %vm468_vm4, %v464_v18, %v472_v21  ;;  %v645_v52 = vsel %vm84_vm5, %v2442_v33, -inf }
 0x1f9   :  { %488 = vmax.xlane.f32.xlu1 %v487_v44  ;;  %v2435_v29 = vadd.f32 %v476_v22, %v2346_v63  ;;  %v205_v36 = vsel %vm84_vm5, %v2448_v4, -inf }
 0x1fb   :  { %v490_v56 = vsel %vm84_vm5, %v2435_v29, -inf }
 0x200   :  { %485 = vmax.xlane.f32.xlu2 %v484_v51 }
 0x208   :  { %640 = vmax.xlane.f32.xlu2 %v639_v61 }
 0x210   :  { %203 = vmax.xlane.f32.xlu2 %v202_v3 }
 0x212   :  { %1979 = vrot.lane.b32.xlu1 %v2299_v20, %s2220_s14 }
 0x218   :  { %333 = vmax.xlane.f32.xlu2 %v332_v8 }
 0x220   :  { %643 = vmax.xlane.f32.xlu2 %v642_v16 }
 0x228   :  { %336 = vmax.xlane.f32.xlu2 %v335_v55 }
 0x230   :  { %491 = vmax.xlane.f32.xlu2 %v490_v56 }
 0x238   :  { %646 = vmax.xlane.f32.xlu2 %v645_v52 }
 0x23c   :  { %206 = vmax.xlane.f32.xlu1 %v205_v36 }
 0x250   :  { %1984 = vrot.lane.b32.xlu2 %v2299_v20, %s2221_s15 }
 0x25b   :  { %v328_v40 = vpop.xlane.xlu2 %327 }
 0x25c   :  { %v201_v42 = vpop.xlane.xlu1 %200  ;;  %v338_v35 = vsub.f32 %v2351_v9, %v328_v40 }
 0x25d   :  { %v211_v63 = vsub.f32 %v2356_v13, %v201_v42 }
 0x25e   :  { %v342_v20 = vmul.f32 1.442695, %v338_v35 }
 0x25f   :  { %v215_v43 = vmul.f32 1.442695, %v211_v63 }
 0x261   :  { %2037 = vpow2.f32 %v215_v43 }
 0x263   :  { %v483_v41 = vpop.xlane.xlu2 %482 }
 0x264   :  { %v493_v44 = vsub.f32 %v2369_v27, %v483_v41  ;;  %v331_v49 = vpop.xlane.xlu1 %330 }
 0x265   :  { %v339_v27 = vsub.f32 %v2371_v28, %v331_v49 }
 0x266   :  { %v497_v45 = vmul.f32 1.442695, %v493_v44 }
 0x267   :  { %v2457_v47 = vpop.eup %2037  ;;  %v344_v60 = vmul.f32 1.442695, %v339_v27 }
 0x268   :  { %2039 = vpow2.f32 %v497_v45  ;;  %v223_v53 = vsel %vm84_vm5, %v2457_v47, 0.0 }
 0x269   :  { %224 = vadd.xlane.f32.xlu1 %v223_v53  ;;  %2041 = vpow2.f32 %v342_v20  ;;  %v210_v20 = vpop.xlane.xlu0 %209 }
 0x26b   :  { %v638_v51 = vpop.xlane.xlu2 %637 }
 0x26c   :  { %v648_v13 = vsub.f32 %v2383_v38, %v638_v51  ;;  %v489_v61 = vpop.xlane.xlu1 %488 }
 0x26d   :  { %v495_v38 = vsub.f32 %v2386_v39, %v489_v61 }
 0x26e   :  { %v2462_v57 = vpop.eup %2039  ;;  %v652_v58 = vmul.f32 1.442695, %v648_v13 }
 0x26f   :  { %v505_v9 = vsel %vm84_vm5, %v2462_v57, 0.0  ;;  %v2468_v2 = vpop.eup %2041  ;;  %v501_v7 = vmul.f32 1.442695, %v495_v38 }
 0x270   :  { %2043 = vpow2.f32 %v652_v58  ;;  %506 = vadd.xlane.f32.xlu0 %v505_v9  ;;  %v350_v5 = vsel %vm84_vm5, %v2468_v2, 0.0 }
 0x271   :  { %2045 = vpow2.f32 %v344_v60 }
 0x273   :  { %v486_v62 = vpop.xlane.xlu2 %485 }
 0x274   :  { %v494_v0 = vsub.f32 %v2396_v48, %v486_v62 }
 0x276   :  { %v2470_v3 = vpop.eup %2043  ;;  %v499_v54 = vmul.f32 1.442695, %v494_v0 }
 0x277   :  { %v660_v28 = vsel %vm84_vm5, %v2470_v3, 0.0  ;;  %v2478_v8 = vpop.eup %2045 }
 0x278   :  { %2047 = vpow2.f32 %v499_v54  ;;  %661 = vadd.xlane.f32.xlu1 %v660_v28  ;;  %v353_v50 = vsel %vm84_vm5, %v2478_v8, 0.0 }
 0x279   :  { %351 = vadd.xlane.f32.xlu2 %v350_v5  ;;  %2049 = vpow2.f32 %v501_v7 }
 0x27b   :  { %v641_v46 = vpop.xlane.xlu2 %640 }
 0x27c   :  { %v649_v48 = vsub.f32 %v2401_v59, %v641_v46 }
 0x27e   :  { %v2480_v11 = vpop.eup %2047  ;;  %v654_v39 = vmul.f32 1.442695, %v649_v48 }
 0x27f   :  { %v508_v12 = vsel %vm84_vm5, %v2480_v11, 0.0  ;;  %v2486_v16 = vpop.eup %2049 }
 0x280   :  { %2051 = vpow2.f32 %v654_v39  ;;  %509 = vadd.xlane.f32.xlu0 %v508_v12  ;;  %v511_v21 = vsel %vm84_vm5, %v2486_v16, 0.0 }
 0x281   :  { %354 = vadd.xlane.f32.xlu2 %v353_v50 }
 0x283   :  { %v204_v15 = vpop.xlane.xlu2 %203 }
 0x284   :  { %v1980_v17 = vpop.permute.xlu1 %1979  ;;  %v212_v52 = vsub.f32 %v2407_v1, %v204_v15 }
 0x285   :  { %v1981_v59 = vunpack.i.l.bf16 %v1980_v17  ;;  %v1982_v55 = vunpack.i.h.bf16 %v1980_v17 }
 0x286   :  { %v2488_v18 = vpop.eup %2051  ;;  %v217_v42 = vmul.f32 1.442695, %v212_v52 }
 0x287   :  { %563 = vmatpush.msrb.mxu0 %v1981_v59  ;;  %v663_v22 = vsel %vm84_vm5, %v2488_v18, 0.0 }
 0x288   :  { %512 = vadd.xlane.f32.xlu0 %v511_v21 }
 0x289   :  { %564 = vmatpush.msrb.mxu0 %v1982_v55  ;;  %664 = vadd.xlane.f32.xlu2 %v663_v22 }
 0x28b   :  { %v334_v23 = vpop.xlane.xlu2 %333 }
 0x28c   :  { %v340_v30 = vsub.f32 %v2416_v6, %v334_v23 }
 0x28e   :  { %v346_v56 = vmul.f32 1.442695, %v340_v30 }
 0x290   :  { %2053 = vpow2.f32 %v346_v56 }
 0x293   :  { %v644_v31 = vpop.xlane.xlu2 %643 }
 0x294   :  { %v650_v32 = vsub.f32 %v2422_v14, %v644_v31 }
 0x296   :  { %v2496_v34 = vpop.eup %2053  ;;  %v656_v36 = vmul.f32 1.442695, %v650_v32 }
 0x297   :  { %v356_v40 = vsel %vm84_vm5, %v2496_v34, 0.0 }
 0x298   :  { %2055 = vpow2.f32 %v656_v36  ;;  %357 = vadd.xlane.f32.xlu1 %v356_v40 }
 0x299   :  { %2057 = vpow2.f32 %v217_v42 }
 0x29b   :  { %v337_v63 = vpop.xlane.xlu2 %336 }
 0x29c   :  { %v341_v43 = vsub.f32 %v2428_v19, %v337_v63 }
 0x29e   :  { %v2502_v6 = vpop.eup %2055  ;;  %v348_v41 = vmul.f32 1.442695, %v341_v43 }
 0x29f   :  { %v666_v14 = vsel %vm84_vm5, %v2502_v6, 0.0  ;;  %v2506_v44 = vpop.eup %2057 }
 0x2a0   :  { %2059 = vpow2.f32 %v348_v41  ;;  %667 = vadd.xlane.f32.xlu1 %v666_v14  ;;  %v226_v19 = vsel %vm84_vm5, %v2506_v44, 0.0 }
 0x2a3   :  { %v492_v1 = vpop.xlane.xlu2 %491 }
 0x2a4   :  { %v496_v45 = vsub.f32 %v2435_v29, %v492_v1  ;;  %v214_v29 = vsub.f32 %v2354_v10, %v210_v20 }
 0x2a6   :  { %v2509_v35 = vpop.eup %2059  ;;  %v503_v49 = vmul.f32 1.442695, %v496_v45  ;;  %v221_v62 = vmul.f32 1.442695, %v214_v29 }
 0x2a7   :  { %v359_v53 = vsel %vm84_vm5, %v2509_v35, 0.0 }
 0x2a8   :  { %2061 = vpow2.f32 %v503_v49  ;;  %227 = vadd.xlane.f32.xlu1 %v226_v19  ;;  %360 = vadd.xlane.f32.xlu0 %v359_v53 }
 0x2ab   :  { %v647_v51 = vpop.xlane.xlu2 %646 }
 0x2ac   :  { %v651_v13 = vsub.f32 %v2442_v33, %v647_v51 }
 0x2ae   :  { %v2516_v58 = vpop.eup %2061  ;;  %v658_v27 = vmul.f32 1.442695, %v651_v13 }
 0x2af   :  { %v207_v9 = vpop.xlane.xlu1 %206  ;;  %v514_v60 = vsel %vm84_vm5, %v2516_v58, 0.0 }
 0x2b0   :  { %2063 = vpow2.f32 %v658_v27  ;;  %v213_v61 = vsub.f32 %v2448_v4, %v207_v9  ;;  %515 = vadd.xlane.f32.xlu2 %v514_v60 }
 0x2b2   :  { %v219_v0 = vmul.f32 1.442695, %v213_v61 }
 0x2b3   :  { %v1985_v38 = vpop.permute.xlu2 %1984 }
 0x2b4   :  { %2065 = vpow2.f32 %v219_v0  ;;  %v1986_v54 = vunpack.i.l.bf16 %v1985_v38  ;;  %v1987_v33 = vunpack.i.h.bf16 %v1985_v38 }
 0x2b5   :  { %2067 = vpow2.f32 %v221_v62 }
 0x2b6   :  { %v2522_v28 = vpop.eup %2063  ;;  %718 = vmatpush.msra.mxu1 %v1986_v54 }
 0x2b7   :  { %v669_v10 = vsel %vm84_vm5, %v2522_v28, 0.0 }
 0x2b8   :  { %719 = vmatpush.msra.mxu1 %v1987_v33  ;;  %670 = vadd.xlane.f32.xlu0 %v669_v10 }
 0x2ba   :  { %v2526_v5 = vpop.eup %2065 }
 0x2bb   :  { %v229_v4 = vsel %vm84_vm5, %v2526_v5, 0.0  ;;  %v2530_v7 = vpop.eup %2067 }
 0x2bc   :  { %230 = vadd.xlane.f32.xlu2 %v229_v4  ;;  %v232_v46 = vsel %vm84_vm5, %v2530_v7, 0.0 }
 0x2c0   :  { %233 = vadd.xlane.f32.xlu0 %v232_v46 }
 0x2dc   :  { %v225_v48 = vpop.xlane.xlu1 %224 }
 0x2dd   :  { %2069 = vrcp.f32 %v225_v48 }
 0x2e3   :  { %v507_v39 = vpop.xlane.xlu0 %506  ;;  %v2070_v12 = vpop.eup %2069 }
 0x2e4   :  { %2071 = vrcp.f32 %v507_v39  ;;  %v239_v50 = vmul.f32 %v2070_v12, %v2457_v47 }
 0x2e6   :  { %1871 = vmatmul.msk.f32.vlgmr.msrb.gmra.mxu1 %vm84_vm5, %v239_v50  ;;  %v770_v50 = vld [vmem:[%s3019_s2 + $0x50] sm:$0xff] }
 0x2e7   :  { %800 = vmatpush.msrb.mxu2 %v770_v50 }
 0x2ea   :  { %v2072_v15 = vpop.eup %2071 }
 0x2eb   :  { %v662_v17 = vpop.xlane.xlu1 %661  ;;  %v521_v59 = vmul.f32 %v2072_v15, %v2462_v57 }
 0x2ec   :  { %2073 = vrcp.f32 %v662_v17  ;;  %v352_v21 = vpop.xlane.xlu2 %351  ;;  %v769_v17 = vld [vmem:[%s3019_s2 + $0x48] sm:$0xff] }
 0x2ed   :  { %2075 = vrcp.f32 %v352_v21  ;;  %1879 = vmatmul.msk.f32.vlgmr.msrb.gmra.mxu0 %vm84_vm5, %v521_v59  ;;  %801 = vmatpush.msrb.mxu2 %v769_v17  ;;  %v768_v59 = vld [vmem:[%s3019_s2 + $0x40] sm:$0xff] }
 0x2ef   :  { %802 = vmatpush.msrb.mxu2 %v768_v59 }
 0x2f2   :  { %v2074_v55 = vpop.eup %2073 }
 0x2f3   :  { %v2076_v22 = vpop.eup %2075  ;;  %v676_v23 = vmul.f32 %v2074_v55, %v2470_v3  ;;  %v510_v30 = vpop.xlane.xlu0 %509  ;;  %v767_v55 = vld [vmem:[%s3019_s2 + $0x38] sm:$0xff] }
 0x2f4   :  { %2077 = vrcp.f32 %v510_v30  ;;  %v355_v56 = vpop.xlane.xlu2 %354  ;;  %v366_v47 = vmul.f32 %v2076_v22, %v2468_v2  ;;  %803 = vmatpush.msrb.mxu2 %v767_v55 }
 0x2f5   :  { %2079 = vrcp.f32 %v355_v56  ;;  %1883 = vmatmul.msk.f32.vlgmr.msra.gmra.mxu1 %vm84_vm5, %v676_v23 }
 0x2f6   :  { %1875 = vmatmul.msk.f32.vlgmr.msrb.gmra.mxu3 %vm84_vm5, %v366_v47 }
 0x2fa   :  { %v2078_v57 = vpop.eup %2077 }
 0x2fb   :  { %v2080_v31 = vpop.eup %2079  ;;  %v513_v32 = vpop.xlane.xlu0 %512  ;;  %v522_v52 = vmul.f32 %v2078_v57, %v2480_v11  ;;  %v2034_v57 = vld [vmem:[%s3019_s2 + $0x30] ss:$0 sm:$0xff] }
 0x2fc   :  { %2081 = vrcp.f32 %v513_v32  ;;  %v665_v36 = vpop.xlane.xlu2 %664  ;;  %v367_v40 = vmul.f32 %v2080_v31, %v2478_v8 }
 0x2fd   :  { %2083 = vrcp.f32 %v665_v36  ;;  %1880 = vmatmul.msk.f32.gmra.mxu0 %vm84_vm5, %v522_v52 }
 0x2fe   :  { %1876 = vmatmul.msk.f32.gmra.mxu3 %vm84_vm5, %v367_v40 }
 0x302   :  { %v2082_v2 = vpop.eup %2081 }
 0x303   :  { %v2084_v3 = vpop.eup %2083  ;;  %v523_v42 = vmul.f32 %v2082_v2, %v2486_v16 }
 0x304   :  { %v677_v63 = vmul.f32 %v2084_v3, %v2488_v18 }
 0x305   :  { %1881 = vmatmul.msk.f32.gmra.mxu0 %vm84_vm5, %v523_v42 }
 0x306   :  { %1884 = vmatmul.msk.f32.gmra.mxu1 %vm84_vm5, %v677_v63 }
 0x30b   :  { %v358_v11 = vpop.xlane.xlu1 %357 }
 0x30c   :  { %2085 = vrcp.f32 %v358_v11 }
 0x312   :  { %v2086_v43 = vpop.eup %2085 }
 0x313   :  { %v668_v41 = vpop.xlane.xlu1 %667  ;;  %v368_v8 = vmul.f32 %v2086_v43, %v2496_v34  ;;  %v774_v43 = vld [vmem:[%s3019_s2 + $0x70] sm:$0xff] }
 0x314   :  { %2087 = vrcp.f32 %v668_v41  ;;  %v773_v41 = vld [vmem:[%s3019_s2 + $0x68] sm:$0xff]  ;;  %841 = vmatpush.msra.mxu3 %v774_v43  ;;  %v2669_v43 = vld [vmem:[%s3018_s1] sm:$0xff] }
 0x315   :  { %1877 = vmatmul.msk.f32.gmra.mxu3 %vm84_vm5, %v368_v8  ;;  %v772_v8 = vld [vmem:[%s3019_s2 + $0x60] sm:$0xff] }
 0x316   :  { %842 = vmatpush.msra.mxu3 %v773_v41 }
 0x318   :  { %843 = vmatpush.msra.mxu3 %v772_v8 }
 0x31a   :  { %v2088_v14 = vpop.eup %2087 }
 0x31b   :  { %v361_v1 = vpop.xlane.xlu0 %360  ;;  %v228_v45 = vpop.xlane.xlu1 %227  ;;  %v678_v16 = vmul.f32 %v2088_v14, %v2502_v6 }
 0x31c   :  { %2089 = vrcp.f32 %v361_v1 }
 0x31d   :  { %2091 = vrcp.f32 %v228_v45  ;;  %1885 = vmatmul.msk.f32.gmra.mxu1 %vm84_vm5, %v678_v16  ;;  %v771_v45 = vld [vmem:[%s3019_s2 + $0x58] sm:$0xff] }
 0x31e   :  { %844 = vmatpush.msra.mxu3 %v771_v45 }
 0x322   :  { %v2090_v18 = vpop.eup %2089 }
 0x323   :  { %v2092_v49 = vpop.eup %2091  ;;  %v516_v19 = vpop.xlane.xlu2 %515  ;;  %v369_v53 = vmul.f32 %v2090_v18, %v2509_v35 }
 0x324   :  { %2093 = vrcp.f32 %v516_v19  ;;  %v240_v34 = vmul.f32 %v2092_v49, %v2506_v44 }
 0x325   :  { %1878 = vmatmul.msk.f32.gmra.mxu3 %vm84_vm5, %v369_v53 }
 0x326   :  { %1872 = vmatmul.msk.f32.vlgmr.msra.gmra.mxu2 %vm84_vm5, %v240_v34 }
 0x32a   :  { %v2094_v20 = vpop.eup %2093 }
 0x32b   :  { %v671_v51 = vpop.xlane.xlu0 %670  ;;  %v524_v6 = vmul.f32 %v2094_v20, %v2516_v58 }
 0x32c   :  { %2095 = vrcp.f32 %v671_v51 }
 0x32d   :  { %1882 = vmatmul.msk.f32.gmra.mxu0 %vm84_vm5, %v524_v6 }
 0x32f   :  { %v231_v13 = vpop.xlane.xlu2 %230 }
 0x330   :  { %2097 = vrcp.f32 %v231_v13 }
 0x332   :  { %v2096_v29 = vpop.eup %2095 }
 0x333   :  { %v234_v27 = vpop.xlane.xlu0 %233  ;;  %v679_v35 = vmul.f32 %v2096_v29, %v2522_v28 }
 0x334   :  { %2099 = vrcp.f32 %v234_v27 }
 0x335   :  { %1886 = vmatmul.msk.f32.gmra.mxu1 %vm84_vm5, %v679_v35 }
 0x336   :  { %v2098_v44 = vpop.eup %2097 }
 0x337   :  { %v241_v9 = vmul.f32 %v2098_v44, %v2526_v5 }
 0x339   :  { %1873 = vmatmul.msk.f32.gmra.mxu2 %vm84_vm5, %v241_v9 }
 0x33a   :  { %v2100_v60 = vpop.eup %2099 }
 0x33b   :  { %v242_v58 = vmul.f32 %v2100_v60, %v2530_v7 }
 0x341   :  { %1874 = vmatmul.msk.f32.gmra.mxu2 %vm84_vm5, %v242_v58 }
 0x363   :  { %v272_v61 = vpop.f32.mrf.mxu1 }
 0x364   :  { %285 = vst.msk [vmem:[#allocation2] sm:$0xff] %vm284_vm8, %v272_v61 }
 0x36a   :  { %v566_v62 = vpop.f32.mrf.mxu0 }
 0x36b   :  { %582 = vrot.lane.b32.xlu2 %v566_v62, %s2226_s24 }
 0x372   :  { %v721_v0 = vpop.f32.mrf.mxu1 }
 0x373   :  { %737 = vrot.lane.b32.xlu0 %v721_v0, %s2227_s25 }
 0x379   :  { %v411_v38 = vpop.f32.mrf.mxu3 }
 0x37a   :  { %427 = vrot.lane.b32.xlu1 %v411_v38, %s2228_s26  ;;  %v569_v54 = vpop.f32.mrf.mxu0 }
 0x37b   :  { %584 = vrot.lane.b32.xlu0 %v569_v54, %s2226_s24 }
 0x381   :  { %v414_v28 = vpop.f32.mrf.mxu3 }
 0x382   :  { %429 = vrot.lane.b32.xlu2 %v414_v28, %s2228_s26  ;;  %v572_v33 = vpop.f32.mrf.mxu0 }
 0x383   :  { %v724_v10 = vpop.f32.mrf.mxu1  ;;  %586 = vrot.lane.b32.xlu0 %v572_v33, %s2226_s24 }
 0x384   :  { %739 = vrot.lane.b32.xlu1 %v724_v10, %s2227_s25 }
 0x398   :  { %v417_v5 = vpop.f32.mrf.mxu3 }
 0x399   :  { %431 = vrot.lane.b32.xlu2 %v417_v5, %s2228_s26 }
 0x39a   :  { %v727_v4 = vpop.f32.mrf.mxu1 }
 0x39b   :  { %741 = vrot.lane.b32.xlu1 %v727_v4, %s2227_s25 }
 0x3a8   :  { %v420_v7 = vpop.f32.mrf.mxu3 }
 0x3a9   :  { %v275_v46 = vpop.f32.mrf.mxu2  ;;  %433 = vrot.lane.b32.xlu2 %v420_v7, %s2228_s26 }
 0x3aa   :  { %286 = vst.msk [vmem:[#allocation2 + $0x8] sm:$0xff] %vm284_vm8, %v275_v46  ;;  %v575_v48 = vpop.f32.mrf.mxu0 }
 0x3ab   :  { %588 = vrot.lane.b32.xlu0 %v575_v48, %s2226_s24 }
 0x3b2   :  { %v730_v39 = vpop.f32.mrf.mxu1 }
 0x3b3   :  { %743 = vrot.lane.b32.xlu1 %v730_v39, %s2227_s25 }
 0x3bc   :  { %v278_v12 = vpop.f32.mrf.mxu2 }
 0x3bd   :  { %287 = vst.msk [vmem:[#allocation2 + $0x10] sm:$0xff] %vm284_vm8, %v278_v12 }
 0x3c4   :  { %v281_v15 = vpop.f32.mrf.mxu2 }
 0x3c5   :  { %288 = vst.msk [vmem:[#allocation2 + $0x18] sm:$0xff] %vm284_vm8, %v281_v15  ;;  %v583_v21 = vpop.permute.xlu2 %582 }
 0x3dc   :  { %v430_v22 = vpop.permute.xlu2 %429 }
 0x3dd   :  { %441 = vst.msk [vmem:[#allocation2 + $0x8] sm:$0xff] %vm439_vm9, %v430_v22 }
 0x3e5   :  { %v738_v23 = vpop.permute.xlu0 %737 }
 0x3ec   :  { %v428_v30 = vpop.permute.xlu1 %427 }
 0x3ed   :  { %440 = vst.msk [vmem:[#allocation2] sm:$0xff] %vm439_vm9, %v428_v30  ;;  %v585_v56 = vpop.permute.xlu0 %584 }
 0x3ee   :  { %595 = vst.msk [vmem:[#allocation2] sm:$0xff] %vm594_vm10, %v583_v21 }
 0x3ef   :  { %750 = vst.msk [vmem:[#allocation2] sm:$0xff] %vm749_vm11, %v738_v23 }
 0x3f0   :  { %596 = vst.msk [vmem:[#allocation2 + $0x8] sm:$0xff] %vm594_vm10, %v585_v56 }
 0x3f3   :  { %v432_v47 = vpop.permute.xlu2 %431 }
 0x3f4   :  { %442 = vst.msk [vmem:[#allocation2 + $0x10] sm:$0xff] %vm439_vm9, %v432_v47 }
 0x3f5   :  { %v587_v31 = vpop.permute.xlu0 %586 }
 0x3f6   :  { %597 = vst.msk [vmem:[#allocation2 + $0x10] sm:$0xff] %vm594_vm10, %v587_v31  ;;  %v740_v32 = vpop.permute.xlu1 %739  ;;  %v754_v52 = vld [vmem:[#allocation2] sm:$0xff] }
 0x3f7   :  { %751 = vst.msk [vmem:[#allocation2 + $0x8] sm:$0xff] %vm749_vm11, %v740_v32  ;;  %v759_v36 = vadd.f32 %v2034_v57, %v754_v52 }
 0x3f9   :  { %v763_v40 = vmax.f32 %v759_v36, 0.0 }
 0x3fb   :  { %1887 = vmatmul.msk.f32.vlgmr.msrb.gmra.mxu2 %vm84_vm5, %v763_v40 }
 0x3fe   :  { %v755_v2 = vld [vmem:[#allocation2 + $0x8] sm:$0xff] }
 0x3ff   :  { %v760_v3 = vadd.f32 %v2034_v57, %v755_v2 }
 0x401   :  { %v764_v42 = vmax.f32 %v760_v3, 0.0 }
 0x403   :  { %v434_v63 = vpop.permute.xlu2 %433  ;;  %1888 = vmatmul.msk.f32.gmra.mxu2 %vm84_vm5, %v764_v42 }
 0x404   :  { %443 = vst.msk [vmem:[#allocation2 + $0x18] sm:$0xff] %vm439_vm9, %v434_v63 }
 0x40d   :  { %v742_v11 = vpop.permute.xlu1 %741 }
 0x40e   :  { %752 = vst.msk [vmem:[#allocation2 + $0x10] sm:$0xff] %vm749_vm11, %v742_v11 }
 0x415   :  { %v756_v14 = vld [vmem:[#allocation2 + $0x10] sm:$0xff] }
 0x416   :  { %v761_v1 = vadd.f32 %v2034_v57, %v756_v14 }
 0x418   :  { %v765_v16 = vmax.f32 %v761_v1, 0.0  ;;  %v2680_v1 = vld [vmem:[%s3018_s1 + $0x18] sm:$0xff] }
 0x41a   :  { %1889 = vmatmul.msk.f32.gmra.mxu2 %vm84_vm5, %v765_v16 }
 0x41d   :  { %v589_v18 = vpop.permute.xlu0 %588 }
 0x41e   :  { %598 = vst.msk [vmem:[#allocation2 + $0x18] sm:$0xff] %vm594_vm10, %v589_v18 }
 0x425   :  { %v744_v49 = vpop.permute.xlu1 %743 }
 0x426   :  { %753 = vst.msk [vmem:[#allocation2 + $0x18] sm:$0xff] %vm749_vm11, %v744_v49 }
 0x42d   :  { %v757_v19 = vld [vmem:[#allocation2 + $0x18] sm:$0xff] }
 0x42e   :  { %v762_v53 = vadd.f32 %v2034_v57, %v757_v19 }
 0x430   :  { %v766_v34 = vmax.f32 %v762_v53, 0.0 }
 0x432   :  { %1890 = vmatmul.msk.f32.gmra.mxu2 %vm84_vm5, %v766_v34 }
 0x47e   :  { %v805_v20 = vpop.f32.mrf.mxu2 }
 0x47f   :  { %1891 = vmatmul.msk.f32.vlgmr.msra.gmra.mxu3 %vm84_vm5, %v805_v20 }
 0x486   :  { %v808_v51 = vpop.f32.mrf.mxu2 }
 0x487   :  { %1892 = vmatmul.msk.f32.gmra.mxu3 %vm84_vm5, %v808_v51  ;;  %v2627_v6 = vpack.i.bf16 %v805_v20, %v808_v51 }
 0x489   :  { %1989 = vrot.lane.b32.xlu1 %v2627_v6, %s2220_s14 }
 0x49d   :  { %v811_v13 = vpop.f32.mrf.mxu2 }
 0x49e   :  { %1893 = vmatmul.msk.f32.gmra.mxu3 %vm84_vm5, %v811_v13 }
 0x4b5   :  { %v814_v29 = vpop.f32.mrf.mxu2 }
 0x4b6   :  { %1894 = vmatmul.msk.f32.gmra.mxu3 %vm84_vm5, %v814_v29  ;;  %999 = vmatpush.msra.mxu0 %v814_v29  ;;  %v2003_v27 = vpack.i.bf16 %v811_v13, %v814_v29 }
 0x4b8   :  { %2004 = vrot.lane.b32.xlu2 %v2003_v27, %s2219_s13  ;;  %1999 = vrot.lane.b32.xlu1 %v2003_v27, %s2221_s15 }
 0x4b9   :  { %1994 = vrot.lane.b32.xlu0 %v2003_v27, %s2220_s14  ;;  %1000 = vmatpush.msra.mxu0 %v811_v13 }
 0x4bb   :  { %1001 = vmatpush.msra.mxu0 %v808_v51 }
 0x4bd   :  { %1002 = vmatpush.msra.mxu0 %v805_v20 }
 0x4fb   :  { %v1990_v62 = vpop.permute.xlu1 %1989 }
 0x4fc   :  { %v1991_v5 = vunpack.i.l.bf16 %v1990_v62  ;;  %v1992_v4 = vunpack.i.h.bf16 %v1990_v62 }
 0x502   :  { %v846_v35 = vpop.f32.mrf.mxu3 }
 0x503   :  { %1175 = vperm.xlu2 %1976, %v846_v35   ;;  %1021 = vperm.xlu1 %2009, %v846_v35  }
 0x504   :  { %1329 = vperm.xlu0 %2008, %v846_v35  }
 0x50a   :  { %v849_v44 = vpop.f32.mrf.mxu3 }
 0x50b   :  { %1179 = vperm.xlu2 %1976, %v849_v44   ;;  %2010 = vset.pattern.permute.xlu1 %v2224_v26 }
 0x50c   :  { %892 = vperm.xlu1 %2010, %v846_v35   ;;  %2014 = vset.pattern.permute.xlu0 %v2223_v25 }
 0x512   :  { %v2005_v9 = vpop.permute.xlu2 %2004 }
 0x513   :  { %v2006_v60 = vunpack.i.l.bf16 %v2005_v9  ;;  %2012 = vset.pattern.permute.xlu2 %v2225_v37  ;;  %v2007_v58 = vunpack.i.h.bf16 %v2005_v9 }
 0x514   :  { %1025 = vperm.xlu2 %2012, %v849_v44   ;;  %2011 = vset.pattern.permute.xlu1 %v2222_v24 }
 0x515   :  { %1137 = vmatpush.msrb.mxu1 %v2006_v60  ;;  %1333 = vperm.xlu1 %2011, %v849_v44  }
 0x517   :  { %1138 = vmatpush.msrb.mxu1 %v2007_v58 }
 0x51c   :  { %2013 = vset.pattern.permute.xlu2 %v2224_v26 }
 0x51d   :  { %897 = vperm.xlu2 %2013, %v849_v44  }
 0x521   :  { %v852_v61 = vpop.f32.mrf.mxu3 }
 0x522   :  { %1337 = vperm.xlu1 %2011, %v852_v61   ;;  %1183 = vperm.xlu0 %2014, %v852_v61  }
 0x52a   :  { %2015 = vset.pattern.permute.xlu1 %v2225_v37  ;;  %v2000_v0 = vpop.permute.xlu1 %1999  ;;  %2016 = vset.pattern.permute.xlu0 %v2224_v26 }
 0x52b   :  { %v2001_v38 = vunpack.i.l.bf16 %v2000_v0  ;;  %v1995_v54 = vpop.permute.xlu0 %1994  ;;  %1029 = vperm.xlu1 %2015, %v852_v61   ;;  %902 = vperm.xlu0 %2016, %v852_v61   ;;  %v2002_v33 = vunpack.i.h.bf16 %v2000_v0  ;;  %v2707_v0 = vld [vmem:[%s3018_s1 + $0x8] sm:$0xff] }
 0x52c   :  { %v1996_v28 = vunpack.i.l.bf16 %v1995_v54  ;;  %v1997_v10 = vunpack.i.h.bf16 %v1995_v54 }
 0x52d   :  { %1445 = vmatpush.msrb.mxu3 %v2001_v38 }
 0x52e   :  { %1291 = vmatpush.msra.mxu2 %v1996_v28 }
 0x52f   :  { %1446 = vmatpush.msrb.mxu3 %v2002_v33 }
 0x530   :  { %1292 = vmatpush.msra.mxu2 %v1997_v10 }
 0x532   :  { %1293 = vmatpush.msra.mxu2 %v1991_v5 }
 0x533   :  { %2018 = vset.pattern.permute.xlu1 %v2222_v24  ;;  %2017 = vset.pattern.permute.xlu0 %v2223_v25 }
 0x534   :  { %1294 = vmatpush.msra.mxu2 %v1992_v4 }
 0x539   :  { %v855_v7 = vpop.f32.mrf.mxu3 }
 0x53a   :  { %1341 = vperm.xlu1 %2018, %v855_v7   ;;  %1187 = vperm.xlu0 %2017, %v855_v7  }
 0x542   :  { %2020 = vset.pattern.permute.xlu1 %v2224_v26  ;;  %2019 = vset.pattern.permute.xlu0 %v2225_v37 }
 0x543   :  { %858 = vxpose.xlu2.b32.start [1/4] (short) (narrow) %v846_v35, 8  ;;  %907 = vperm.xlu1 %2020, %v855_v7  }
 0x544   :  { %1033 = vperm.xlu0 %2019, %v855_v7  }
 0x54b   :  { %859 = vxpose.xlu2.b32.cont [2/4] (short) (narrow) %v849_v44, 8 }
 0x553   :  { %860 = vxpose.xlu2.b32.cont [3/4] (short) (narrow) %v852_v61, 8 }
 0x55b   :  { %861 = vxpose.xlu2.b32.end [4/4] (short) (narrow) %v855_v7, 8 }
 0x55d   :  { %v1176_v46 = vpop.permute.xlu2 %1175 }
 0x565   :  { %v1180_v39 = vpop.permute.xlu2 %1179 }
 0x56e   :  { %v1026_v12 = vpop.permute.xlu2 %1025 }
 0x575   :  { %v1022_v25 = vpop.permute.xlu1 %1021 }
 0x576   :  { %v1330_v48 = vpop.permute.xlu0 %1329 }
 0x577   :  { %v2651_v17 = vpop.permute.xlu2 %897 }
 0x57e   :  { %v893_v15 = vpop.permute.xlu1 %892 }
 0x587   :  { %v1334_v37 = vpop.permute.xlu1 %1333 }
 0x594   :  { %v2647_v24 = vpop.permute.xlu0 %1183  ;;  %v2664_v11 = vpop.permute.xlu1 %1337 }
 0x59d   :  { %v2649_v50 = vpop.permute.xlu0 %902  ;;  %v1030_v35 = vpop.permute.xlu1 %1029 }
 0x5ac   :  { %v2653_v26 = vpop.permute.xlu0 %1187 }
 0x5b6   :  { %v1034_v30 = vpop.permute.xlu0 %1033 }
 0x5dc   :  { %v874_v59 = vpop.trf.xlu2 }
 0x5dd   :  { %v2655_v21 = vperm.slane %v874_v59, 0  ;;  %v1036_v55 = vperm.slane %v874_v59, 1  ;;  %v2657_v22 = vperm.slane %v874_v59, 2  ;;  %v2659_v23 = vperm.slane %v874_v59, 3 }
 0x5df   :  { %v1345_v56 = vadd.f32 %v2659_v23, %v1330_v48  ;;  %v1191_v47 = vadd.f32 %v2657_v22, %v1176_v46  ;;  %v1040_v57 = vadd.f32 %v1036_v55, %v1034_v30  ;;  %v1037_v31 = vadd.f32 %v1036_v55, %v1022_v25  ;;  %v2729_v25 = vld [vmem:[%s3018_s1 + $0x10] sm:$0xff] }
 0x5e0   :  { %v911_v32 = vadd.f32 %v2655_v21, %v893_v15  ;;  %v1346_v49 = vadd.f32 %v2659_v23, %v1334_v37  ;;  %v1192_v20 = vadd.f32 %v2657_v22, %v1180_v39  ;;  %v1038_v60 = vadd.f32 %v1036_v55, %v1026_v12  ;;  %v1342_v37 = vpop.permute.xlu1 %1341 }
 0x5e1   :  { %vm1349_vm12 = vcmp.gt.f32.partialorder %v1345_v56, 0.0  ;;  %v1353_v52 = vmul.f32 0.2, %v1345_v56  ;;  %vm1195_vm13 = vcmp.gt.f32.partialorder %v1191_v47, 0.0  ;;  %v1199_v36 = vmul.f32 0.2, %v1191_v47 }
 0x5e2   :  { %vm1044_vm14 = vcmp.gt.f32.partialorder %v1040_v57, 0.0  ;;  %v1048_v40 = vmul.f32 0.2, %v1040_v57  ;;  %vm1041_vm15 = vcmp.gt.f32.partialorder %v1037_v31, 0.0  ;;  %v1045_v42 = vmul.f32 0.2, %v1037_v31 }
 0x5e3   :  { %v1357_v2 = vsel %vm1349_vm12, %v1345_v56, %v1353_v52  ;;  %v1203_v3 = vsel %vm1195_vm13, %v1191_v47, %v1199_v36  ;;  %v919_v63 = vmul.f32 0.2, %v911_v32  ;;  %vm915_vm0 = vcmp.gt.f32.partialorder %v911_v32, 0.0 }
 0x5e4   :  { %v2672_v41 = vadd.f32 %v2669_v43, %v1357_v2  ;;  %v2675_v8 = vadd.f32 %v2669_v43, %v1203_v3  ;;  %v1052_v14 = vsel %vm1044_vm14, %v1040_v57, %v1048_v40  ;;  %v1049_v53 = vsel %vm1041_vm15, %v1037_v31, %v1045_v42 }
 0x5e5   :  { %v2683_v45 = vadd.f32 %v2680_v1, %v1052_v14  ;;  %v923_v34 = vsel %vm915_vm0, %v911_v32, %v919_v63  ;;  %v2695_v51 = vadd.f32 %v2669_v43, %v1049_v53  ;;  %v1354_v29 = vmul.f32 0.2, %v1346_v49 }
 0x5e6   :  { %v1365_v16 = vsel %vm84_vm5, %v2672_v41, -inf  ;;  %v1211_v18 = vsel %vm84_vm5, %v2675_v8, -inf  ;;  %v2698_v13 = vadd.f32 %v2669_v43, %v923_v34  ;;  %v1200_v27 = vmul.f32 0.2, %v1192_v20 }
 0x5e7   :  { %1366 = vmax.xlane.f32.xlu0 %v1365_v16  ;;  %1212 = vmax.xlane.f32.xlu1 %v1211_v18  ;;  %v1066_v19 = vsel %vm84_vm5, %v2683_v45, -inf  ;;  %vm1350_vm2 = vcmp.gt.f32.partialorder %v1346_v49, 0.0  ;;  %vm1196_vm3 = vcmp.gt.f32.partialorder %v1192_v20, 0.0  ;;  %v1057_v44 = vsel %vm84_vm5, %v2695_v51, -inf }
 0x5e8   :  { %1067 = vmax.xlane.f32.xlu2 %v1066_v19  ;;  %v931_v9 = vsel %vm84_vm5, %v2698_v13, -inf  ;;  %v1358_v58 = vsel %vm1350_vm2, %v1346_v49, %v1354_v29  ;;  %v1204_v61 = vsel %vm1196_vm3, %v1192_v20, %v1200_v27  ;;  %v1039_v62 = vadd.f32 %v1036_v55, %v1030_v35  ;;  %v2777_v27 = vpop.permute.xlu1 %907 }
 0x5e9   :  { %v2710_v38 = vadd.f32 %v2707_v0, %v1358_v58  ;;  %v2713_v54 = vadd.f32 %v2707_v0, %v1204_v61  ;;  %v1046_v28 = vmul.f32 0.2, %v1038_v60  ;;  %vm1042_vm4 = vcmp.gt.f32.partialorder %v1038_v60, 0.0 }
 0x5ea   :  { %v1047_v33 = vmul.f32 0.2, %v1039_v62  ;;  %vm1043_vm6 = vcmp.gt.f32.partialorder %v1039_v62, 0.0  ;;  %v912_v4 = vadd.f32 %v2655_v21, %v2651_v17  ;;  %v913_v48 = vadd.f32 %v2655_v21, %v2649_v50 }
 0x5eb   :  { %v1368_v10 = vsel %vm84_vm5, %v2710_v38, -inf  ;;  %v1214_v5 = vsel %vm84_vm5, %v2713_v54, -inf  ;;  %v1050_v7 = vsel %vm1042_vm4, %v1038_v60, %v1046_v28  ;;  %v1193_v55 = vadd.f32 %v2657_v22, %v2647_v24 }
 0x5ec   :  { %v1051_v46 = vsel %vm1043_vm6, %v1039_v62, %v1047_v33  ;;  %v2724_v39 = vadd.f32 %v2707_v0, %v1050_v7  ;;  %v920_v15 = vmul.f32 0.2, %v912_v4  ;;  %v921_v17 = vmul.f32 0.2, %v913_v48 }
 0x5ed   :  { %v2732_v12 = vadd.f32 %v2729_v25, %v1051_v46  ;;  %vm916_vm7 = vcmp.gt.f32.partialorder %v912_v4, 0.0  ;;  %vm917_vm12 = vcmp.gt.f32.partialorder %v913_v48, 0.0  ;;  %v1348_v47 = vadd.f32 %v2659_v23, %v1342_v37 }
 0x5ee   :  { %v1060_v59 = vsel %vm84_vm5, %v2724_v39, -inf  ;;  %v924_v30 = vsel %vm916_vm7, %v912_v4, %v920_v15  ;;  %v925_v56 = vsel %vm917_vm12, %v913_v48, %v921_v17  ;;  %v1201_v32 = vmul.f32 0.2, %v1193_v55 }
 0x5ef   :  { %1058 = vmax.xlane.f32.xlu1 %v1057_v44  ;;  %932 = vmax.xlane.f32.xlu0 %v931_v9  ;;  %v1063_v50 = vsel %vm84_vm5, %v2732_v12, -inf  ;;  %v2744_v57 = vadd.f32 %v2707_v0, %v924_v30  ;;  %v2747_v31 = vadd.f32 %v2729_v25, %v925_v56  ;;  %v1356_v52 = vmul.f32 0.2, %v1348_v47 }
 0x5f0   :  { %vm1197_vm13 = vcmp.gt.f32.partialorder %v1193_v55, 0.0  ;;  %vm1352_vm14 = vcmp.gt.f32.partialorder %v1348_v47, 0.0  ;;  %v1347_v3 = vadd.f32 %v2659_v23, %v2664_v11  ;;  %v1194_v23 = vadd.f32 %v2657_v22, %v2653_v26 }
 0x5f1   :  { %v934_v24 = vsel %vm84_vm5, %v2744_v57, -inf  ;;  %v937_v36 = vsel %vm84_vm5, %v2747_v31, -inf  ;;  %v1205_v40 = vsel %vm1197_vm13, %v1193_v55, %v1201_v32  ;;  %v1360_v2 = vsel %vm1352_vm14, %v1348_v47, %v1356_v52 }
 0x5f2   :  { %v2756_v42 = vadd.f32 %v2729_v25, %v1205_v40  ;;  %v2759_v63 = vadd.f32 %v2680_v1, %v1360_v2  ;;  %v1355_v14 = vmul.f32 0.2, %v1347_v3  ;;  %vm1351_vm15 = vcmp.gt.f32.partialorder %v1347_v3, 0.0 }
 0x5f3   :  { %v1202_v19 = vmul.f32 0.2, %v1194_v23  ;;  %vm1198_vm0 = vcmp.gt.f32.partialorder %v1194_v23, 0.0 }
 0x5f4   :  { %v1217_v16 = vsel %vm84_vm5, %v2756_v42, -inf  ;;  %v1374_v18 = vsel %vm84_vm5, %v2759_v63, -inf  ;;  %v1359_v49 = vsel %vm1351_vm15, %v1347_v3, %v1355_v14  ;;  %vm1845_vm15 = vcmask 0  }
 0x5f5   :  { %v2768_v11 = vadd.f32 %v2729_v25, %v1359_v49  ;;  %v1206_v34 = vsel %vm1198_vm0, %v1194_v23, %v1202_v19 }
 0x5f6   :  { %v2773_v20 = vadd.f32 %v2680_v1, %v1206_v34 }
 0x5f7   :  { %1369 = vmax.xlane.f32.xlu1 %v1368_v10  ;;  %1215 = vmax.xlane.f32.xlu0 %v1214_v5  ;;  %v1371_v53 = vsel %vm84_vm5, %v2768_v11, -inf }
 0x5f8   :  { %v1220_v29 = vsel %vm84_vm5, %v2773_v20, -inf }
 0x5ff   :  { %1061 = vmax.xlane.f32.xlu1 %v1060_v59  ;;  %1064 = vmax.xlane.f32.xlu0 %v1063_v50 }
 0x600   :  { %2022 = vrot.lane.b32.xlu2 %v2627_v6, %s2221_s15 }
 0x607   :  { %935 = vmax.xlane.f32.xlu1 %v934_v24  ;;  %938 = vmax.xlane.f32.xlu0 %v937_v36 }
 0x60f   :  { %1218 = vmax.xlane.f32.xlu1 %v1217_v16  ;;  %1375 = vmax.xlane.f32.xlu0 %v1374_v18 }
 0x617   :  { %1372 = vmax.xlane.f32.xlu1 %v1371_v53 }
 0x61f   :  { %1221 = vmax.xlane.f32.xlu1 %v1220_v29 }
 0x65a   :  { %v1367_v26 = vpop.xlane.xlu0 %1366  ;;  %v1213_v22 = vpop.xlane.xlu1 %1212 }
 0x65b   :  { %v1377_v35 = vsub.f32 %v2672_v41, %v1367_v26  ;;  %v1223_v44 = vsub.f32 %v2675_v8, %v1213_v22  ;;  %v2781_v9 = vpop.xlane.xlu2 %1067 }
 0x65c   :  { %v1072_v22 = vsub.f32 %v2683_v45, %v2781_v9 }
 0x65d   :  { %v1381_v60 = vmul.f32 1.442695, %v1377_v35  ;;  %v1227_v58 = vmul.f32 1.442695, %v1223_v44 }
 0x65f   :  { %2101 = vpow2.f32 %v1381_v60  ;;  %v914_v60 = vadd.f32 %v2655_v21, %v2777_v27 }
 0x660   :  { %2103 = vpow2.f32 %v1227_v58  ;;  %v1079_v58 = vmul.f32 1.442695, %v1072_v22 }
 0x661   :  { %vm918_vm2 = vcmp.gt.f32.partialorder %v914_v60, 0.0 }
 0x662   :  { %v1059_v61 = vpop.xlane.xlu1 %1058  ;;  %v2783_v62 = vpop.xlane.xlu0 %932 }
 0x663   :  { %v2023_v28 = vpop.permute.xlu2 %2022  ;;  %v1069_v33 = vsub.f32 %v2695_v51, %v1059_v61  ;;  %v943_v45 = vsub.f32 %v2698_v13, %v2783_v62 }
 0x664   :  { %v2024_v10 = vunpack.i.l.bf16 %v2023_v28  ;;  %v2025_v41 = vunpack.i.h.bf16 %v2023_v28 }
 0x665   :  { %v2786_v5 = vpop.eup %2101  ;;  %v1073_v4 = vmul.f32 1.442695, %v1069_v33 }
 0x666   :  { %v2788_v7 = vpop.eup %2103  ;;  %1447 = vmatpush.msrb.mxu3 %v2024_v10  ;;  %v1389_v8 = vsel %vm84_vm5, %v2786_v5, 0.0 }
 0x667   :  { %2105 = vpow2.f32 %v1073_v4  ;;  %1390 = vadd.xlane.f32.xlu1 %v1389_v8  ;;  %v1235_v46 = vsel %vm84_vm5, %v2788_v7, 0.0  ;;  %v947_v4 = vmul.f32 1.442695, %v943_v45 }
 0x668   :  { %1448 = vmatpush.msrb.mxu3 %v2025_v41  ;;  %1236 = vadd.xlane.f32.xlu0 %v1235_v46 }
 0x66a   :  { %v1370_v48 = vpop.xlane.xlu1 %1369  ;;  %v1216_v51 = vpop.xlane.xlu0 %1215 }
 0x66b   :  { %v1378_v15 = vsub.f32 %v2710_v38, %v1370_v48  ;;  %v1224_v17 = vsub.f32 %v2713_v54, %v1216_v51 }
 0x66d   :  { %v2796_v37 = vpop.eup %2105  ;;  %v1383_v59 = vmul.f32 1.442695, %v1378_v15  ;;  %v1229_v50 = vmul.f32 1.442695, %v1224_v17 }
 0x66e   :  { %v1081_v55 = vsel %vm84_vm5, %v2796_v37, 0.0 }
 0x66f   :  { %2107 = vpow2.f32 %v1383_v59  ;;  %1082 = vadd.xlane.f32.xlu2 %v1081_v55 }
 0x670   :  { %2109 = vpow2.f32 %v1229_v50 }
 0x672   :  { %v1062_v30 = vpop.xlane.xlu1 %1061 }
 0x673   :  { %v1070_v56 = vsub.f32 %v2724_v39, %v1062_v30  ;;  %v1065_v39 = vpop.xlane.xlu0 %1064 }
 0x675   :  { %v2801_v47 = vpop.eup %2107  ;;  %v1075_v32 = vmul.f32 1.442695, %v1070_v56 }
 0x676   :  { %v2803_v52 = vpop.eup %2109  ;;  %v1392_v38 = vsel %vm84_vm5, %v2801_v47, 0.0 }
 0x677   :  { %2111 = vpow2.f32 %v1075_v32  ;;  %1393 = vadd.xlane.f32.xlu2 %v1392_v38  ;;  %v1238_v54 = vsel %vm84_vm5, %v2803_v52, 0.0 }
 0x678   :  { %1239 = vadd.xlane.f32.xlu1 %v1238_v54 }
 0x67a   :  { %v936_v24 = vpop.xlane.xlu1 %935 }
 0x67b   :  { %v939_v16 = vpop.xlane.xlu0 %938  ;;  %v944_v33 = vsub.f32 %v2744_v57, %v936_v24 }
 0x67c   :  { %2027 = vrot.lane.b32.xlu0 %v2627_v6, %s2219_s13  ;;  %v1071_v6 = vsub.f32 %v2732_v12, %v1065_v39 }
 0x67d   :  { %v2811_v36 = vpop.eup %2111  ;;  %v949_v62 = vmul.f32 1.442695, %v944_v33 }
 0x67e   :  { %v1084_v40 = vsel %vm84_vm5, %v2811_v36, 0.0  ;;  %v1077_v34 = vmul.f32 1.442695, %v1071_v6 }
 0x680   :  { %1085 = vadd.xlane.f32.xlu1 %v1084_v40 }
 0x682   :  { %v1219_v2 = vpop.xlane.xlu1 %1218 }
 0x683   :  { %v1225_v3 = vsub.f32 %v2756_v42, %v1219_v2  ;;  %v1376_v29 = vpop.xlane.xlu0 %1375 }
 0x685   :  { %v1231_v14 = vmul.f32 1.442695, %v1225_v3 }
 0x687   :  { %2113 = vpow2.f32 %v1231_v14 }
 0x68a   :  { %v1373_v18 = vpop.xlane.xlu1 %1372 }
 0x68b   :  { %v1379_v49 = vsub.f32 %v2768_v11, %v1373_v18  ;;  %v1380_v11 = vsub.f32 %v2759_v63, %v1376_v29  ;;  %v945_v63 = vsub.f32 %v2747_v31, %v939_v16 }
 0x68d   :  { %v2817_v23 = vpop.eup %2113  ;;  %v1385_v19 = vmul.f32 1.442695, %v1379_v49  ;;  %v1387_v61 = vmul.f32 1.442695, %v1380_v11  ;;  %v951_v13 = vmul.f32 1.442695, %v945_v63 }
 0x68e   :  { %v1241_v53 = vsel %vm84_vm5, %v2817_v23, 0.0 }
 0x68f   :  { %2115 = vpow2.f32 %v1385_v19  ;;  %1242 = vadd.xlane.f32.xlu1 %v1241_v53 }
 0x690   :  { %2117 = vpow2.f32 %v1077_v34 }
 0x692   :  { %v1222_v26 = vpop.xlane.xlu1 %1221 }
 0x693   :  { %v1226_v42 = vsub.f32 %v2773_v20, %v1222_v26  ;;  %v922_v20 = vmul.f32 0.2, %v914_v60 }
 0x695   :  { %v2825_v35 = vpop.eup %2115  ;;  %v1233_v12 = vmul.f32 1.442695, %v1226_v42  ;;  %v926_v10 = vsel %vm918_vm2, %v914_v60, %v922_v20 }
 0x696   :  { %v1395_v44 = vsel %vm84_vm5, %v2825_v35, 0.0  ;;  %v2832_v28 = vpop.eup %2117  ;;  %v2845_v41 = vadd.f32 %v2680_v1, %v926_v10 }
 0x697   :  { %2119 = vpow2.f32 %v1233_v12  ;;  %1396 = vadd.xlane.f32.xlu1 %v1395_v44  ;;  %v1087_v27 = vsel %vm84_vm5, %v2832_v28, 0.0 }
 0x698   :  { %2121 = vpow2.f32 %v1079_v58  ;;  %v940_v57 = vsel %vm84_vm5, %v2845_v41, -inf }
 0x699   :  { %2123 = vpow2.f32 %v1387_v61 }
 0x69a   :  { %2125 = vpow2.f32 %v947_v4 }
 0x69b   :  { %2127 = vpow2.f32 %v951_v13 }
 0x69c   :  { %2129 = vpow2.f32 %v949_v62 }
 0x69d   :  { %v2837_v9 = vpop.eup %2119 }
 0x69e   :  { %v1244_v21 = vsel %vm84_vm5, %v2837_v9, 0.0  ;;  %v2847_v31 = vpop.eup %2121 }
 0x69f   :  { %1245 = vadd.xlane.f32.xlu2 %v1244_v21  ;;  %1088 = vadd.xlane.f32.xlu1 %v1087_v27  ;;  %v2849_v8 = vpop.eup %2123  ;;  %v1090_v46 = vsel %vm84_vm5, %v2847_v31, 0.0 }
 0x6a0   :  { %v1398_v48 = vsel %vm84_vm5, %v2849_v8, 0.0  ;;  %v2857_v51 = vpop.eup %2125 }
 0x6a1   :  { %v2859_v15 = vpop.eup %2127  ;;  %v955_v55 = vsel %vm84_vm5, %v2857_v51, 0.0 }
 0x6a2   :  { %v2861_v17 = vpop.eup %2129  ;;  %v961_v59 = vsel %vm84_vm5, %v2859_v15, 0.0 }
 0x6a3   :  { %v958_v50 = vsel %vm84_vm5, %v2861_v17, 0.0 }
 0x6a6   :  { %941 = vmax.xlane.f32.xlu0 %v940_v57 }
 0x6a7   :  { %1091 = vadd.xlane.f32.xlu2 %v1090_v46  ;;  %1399 = vadd.xlane.f32.xlu1 %v1398_v48 }
 0x6ae   :  { %962 = vadd.xlane.f32.xlu0 %v961_v59 }
 0x6af   :  { %959 = vadd.xlane.f32.xlu2 %v958_v50  ;;  %956 = vadd.xlane.f32.xlu1 %v955_v55 }
 0x6da   :  { %v1391_v30 = vpop.xlane.xlu1 %1390 }
 0x6db   :  { %2131 = vrcp.f32 %v1391_v30  ;;  %v1237_v56 = vpop.xlane.xlu0 %1236 }
 0x6dc   :  { %2133 = vrcp.f32 %v1237_v56 }
 0x6e1   :  { %v2132_v32 = vpop.eup %2131 }
 0x6e2   :  { %v2134_v38 = vpop.eup %2133  ;;  %v1405_v54 = vmul.f32 %v2132_v32, %v2786_v5  ;;  %v1083_v24 = vpop.xlane.xlu2 %1082 }
 0x6e3   :  { %v1251_v39 = vmul.f32 %v2134_v38, %v2788_v7  ;;  %2135 = vrcp.f32 %v1083_v24  ;;  %v1498_v38 = vld [vmem:[%s3019_s2 + $0x98] sm:$0xff] }
 0x6e4   :  { %1907 = vmatmul.msk.f32.vlgmr.msrb.gmra.mxu3 %vm84_vm5, %v1405_v54  ;;  %1526 = vmatpush.msrb.mxu0 %v1498_v38 }
 0x6e5   :  { %1903 = vmatmul.msk.f32.vlgmr.msra.gmra.mxu2 %vm84_vm5, %v1251_v39 }
 0x6e9   :  { %v2136_v14 = vpop.eup %2135 }
 0x6ea   :  { %v1394_v40 = vpop.xlane.xlu2 %1393  ;;  %v1097_v5 = vmul.f32 %v2136_v14, %v2796_v37  ;;  %v1497_v14 = vld [vmem:[%s3019_s2 + $0x90] sm:$0xff] }
 0x6eb   :  { %2137 = vrcp.f32 %v1394_v40  ;;  %v1240_v2 = vpop.xlane.xlu1 %1239  ;;  %1527 = vmatpush.msrb.mxu0 %v1497_v14 }
 0x6ec   :  { %2139 = vrcp.f32 %v1240_v2 }
 0x6ee   :  { %v2028_v3 = vpop.permute.xlu0 %2027 }
 0x6ef   :  { %v2029_v16 = vunpack.i.l.bf16 %v2028_v3  ;;  %v2030_v49 = vunpack.i.h.bf16 %v2028_v3 }
 0x6f1   :  { %v2138_v18 = vpop.eup %2137  ;;  %1139 = vmatpush.msrb.mxu1 %v2029_v16 }
 0x6f2   :  { %v2140_v6 = vpop.eup %2139  ;;  %v1406_v7 = vmul.f32 %v2138_v18, %v2801_v47  ;;  %v1496_v18 = vld [vmem:[%s3019_s2 + $0x88] sm:$0xff] }
 0x6f3   :  { %v1086_v19 = vpop.xlane.xlu1 %1085  ;;  %1140 = vmatpush.msrb.mxu1 %v2030_v49  ;;  %v1252_v53 = vmul.f32 %v2140_v6, %v2803_v52  ;;  %1528 = vmatpush.msrb.mxu0 %v1496_v18  ;;  %v1495_v6 = vld [vmem:[%s3019_s2 + $0x80] sm:$0xff] }
 0x6f4   :  { %2141 = vrcp.f32 %v1086_v19  ;;  %1899 = vmatmul.msk.f32.vlgmr.msrb.gmra.mxu1 %vm84_vm5, %v1097_v5  ;;  %1908 = vmatmul.msk.f32.gmra.mxu3 %vm84_vm5, %v1406_v7 }
 0x6f5   :  { %1904 = vmatmul.msk.f32.gmra.mxu2 %vm84_vm5, %v1252_v53  ;;  %1529 = vmatpush.msrb.mxu0 %v1495_v6 }
 0x6fa   :  { %v2142_v34 = vpop.eup %2141 }
 0x6fb   :  { %v1098_v29 = vmul.f32 %v2142_v34, %v2811_v36  ;;  %v2035_v34 = vld [vmem:[%s3019_s2 + $0x78] ss:$0 sm:$0xff] }
 0x6fd   :  { %1900 = vmatmul.msk.f32.gmra.mxu1 %vm84_vm5, %v1098_v29 }
 0x702   :  { %v1243_v26 = vpop.xlane.xlu1 %1242 }
 0x703   :  { %2143 = vrcp.f32 %v1243_v26 }
 0x709   :  { %v2144_v37 = vpop.eup %2143 }
 0x70a   :  { %v1397_v47 = vpop.xlane.xlu1 %1396  ;;  %v1253_v42 = vmul.f32 %v2144_v37, %v2817_v23 }
 0x70b   :  { %2145 = vrcp.f32 %v1397_v47 }
 0x70c   :  { %1905 = vmatmul.msk.f32.gmra.mxu2 %vm84_vm5, %v1253_v42 }
 0x711   :  { %v2146_v52 = vpop.eup %2145 }
 0x712   :  { %v1246_v22 = vpop.xlane.xlu2 %1245  ;;  %v1089_v11 = vpop.xlane.xlu1 %1088  ;;  %v1407_v12 = vmul.f32 %v2146_v52, %v2825_v35 }
 0x713   :  { %2147 = vrcp.f32 %v1246_v22 }
 0x714   :  { %2149 = vrcp.f32 %v1089_v11  ;;  %1909 = vmatmul.msk.f32.gmra.mxu3 %vm84_vm5, %v1407_v12 }
 0x719   :  { %v2148_v36 = vpop.eup %2147  ;;  %v942_v44 = vpop.xlane.xlu0 %941 }
 0x71a   :  { %v2150_v60 = vpop.eup %2149  ;;  %v946_v58 = vsub.f32 %v2845_v41, %v942_v44  ;;  %v1092_v61 = vpop.xlane.xlu2 %1091  ;;  %v1254_v23 = vmul.f32 %v2148_v36, %v2837_v9 }
 0x71b   :  { %v1400_v20 = vpop.xlane.xlu1 %1399  ;;  %2151 = vrcp.f32 %v1092_v61  ;;  %v1099_v45 = vmul.f32 %v2150_v60, %v2832_v28  ;;  %v1500_v60 = vld [vmem:[%s3019_s2 + $0xa8] sm:$0xff] }
 0x71c   :  { %v953_v63 = vmul.f32 1.442695, %v946_v58  ;;  %2153 = vrcp.f32 %v1400_v20  ;;  %1906 = vmatmul.msk.f32.gmra.mxu2 %vm84_vm5, %v1254_v23  ;;  %v1499_v58 = vld [vmem:[%s3019_s2 + $0xa0] sm:$0xff]  ;;  %1569 = vmatpush.msra.mxu1 %v1500_v60 }
 0x71d   :  { %1901 = vmatmul.msk.f32.gmra.mxu1 %vm84_vm5, %v1099_v45 }
 0x71e   :  { %2155 = vpow2.f32 %v953_v63  ;;  %1570 = vmatpush.msra.mxu1 %v1499_v58 }
 0x721   :  { %v2152_v35 = vpop.eup %2151  ;;  %v963_v41 = vpop.xlane.xlu0 %962 }
 0x722   :  { %v2154_v33 = vpop.eup %2153  ;;  %v1100_v27 = vmul.f32 %v2152_v35, %v2847_v31  ;;  %v960_v9 = vpop.xlane.xlu2 %959 }
 0x723   :  { %v957_v21 = vpop.xlane.xlu1 %956  ;;  %v1408_v10 = vmul.f32 %v2154_v33, %v2849_v8 }
 0x724   :  { %v2156_v4 = vpop.eup %2155  ;;  %2157 = vrcp.f32 %v957_v21 }
 0x725   :  { %1902 = vmatmul.msk.f32.gmra.mxu1 %vm84_vm5, %v1100_v27  ;;  %1910 = vmatmul.msk.f32.gmra.mxu3 %vm84_vm5, %v1408_v10  ;;  %v964_v28 = vsel %vm84_vm5, %v2156_v4, 0.0  ;;  %2159 = vrcp.f32 %v960_v9  ;;  %v2229_v9 = vmov 1  }
 0x726   :  { %965 = vadd.xlane.f32.xlu1 %v964_v28  ;;  %2161 = vrcp.f32 %v963_v41  ;;  %2032 = vset.pattern.permute.xlu0 %v2229_v9 }
 0x727   :  { %2031 = vset.pattern.permute.xlu1 %v2229_v9  ;;  %2033 = vset.pattern.permute.xlu2 %v2229_v9 }
 0x72a   :  { %v2158_v13 = vpop.eup %2157 }
 0x72b   :  { %v971_v62 = vmul.f32 %v2158_v13, %v2857_v51  ;;  %v2160_v31 = vpop.eup %2159 }
 0x72c   :  { %v972_v8 = vmul.f32 %v2160_v31, %v2861_v17  ;;  %v2162_v57 = vpop.eup %2161 }
 0x72d   :  { %1895 = vmatmul.msk.f32.vlgmr.msra.gmra.mxu0 %vm84_vm5, %v971_v62  ;;  %v973_v46 = vmul.f32 %v2162_v57, %v2859_v15 }
 0x735   :  { %1896 = vmatmul.msk.f32.gmra.mxu0 %vm84_vm5, %v972_v8 }
 0x73d   :  { %1897 = vmatmul.msk.f32.gmra.mxu0 %vm84_vm5, %v973_v46 }
 0x767   :  { %v1450_v48 = vpop.f32.mrf.mxu3 }
 0x768   :  { %v1296_v59 = vpop.f32.mrf.mxu2  ;;  %1466 = vrot.lane.b32.xlu1 %v1450_v48, %s2227_s25 }
 0x769   :  { %1312 = vrot.lane.b32.xlu0 %v1296_v59, %s2226_s24 }
 0x771   :  { %v1142_v51 = vpop.f32.mrf.mxu1 }
 0x772   :  { %1158 = vrot.lane.b32.xlu2 %v1142_v51, %s2228_s26 }
 0x777   :  { %v1453_v55 = vpop.f32.mrf.mxu3 }
 0x778   :  { %v1299_v50 = vpop.f32.mrf.mxu2 }
 0x779   :  { %1314 = vrot.lane.b32.xlu0 %v1299_v50, %s2226_s24 }
 0x77a   :  { %v1145_v17 = vpop.f32.mrf.mxu1 }
 0x77b   :  { %1160 = vrot.lane.b32.xlu2 %v1145_v17, %s2228_s26 }
 0x783   :  { %1468 = vrot.lane.b32.xlu2 %v1453_v55, %s2227_s25 }
 0x78f   :  { %v1302_v15 = vpop.f32.mrf.mxu2 }
 0x790   :  { %1316 = vrot.lane.b32.xlu0 %v1302_v15, %s2226_s24 }
 0x797   :  { %v1456_v30 = vpop.f32.mrf.mxu3 }
 0x798   :  { %1470 = vrot.lane.b32.xlu2 %v1456_v30, %s2227_s25 }
 0x799   :  { %v966_v56 = vpop.xlane.xlu1 %965 }
 0x79a   :  { %2163 = vrcp.f32 %v966_v56  ;;  %v1148_v32 = vpop.f32.mrf.mxu1 }
 0x79b   :  { %1162 = vrot.lane.b32.xlu1 %v1148_v32, %s2228_s26 }
 0x79f   :  { %v1305_v54 = vpop.f32.mrf.mxu2 }
 0x7a0   :  { %v2164_v24 = vpop.eup %2163  ;;  %1318 = vrot.lane.b32.xlu0 %v1305_v54, %s2226_s24 }
 0x7a1   :  { %v974_v39 = vmul.f32 %v2164_v24, %v2156_v4 }
 0x7a2   :  { %v1151_v40 = vpop.f32.mrf.mxu1 }
 0x7a3   :  { %1898 = vmatmul.msk.f32.gmra.mxu0 %vm84_vm5, %v974_v39  ;;  %1164 = vrot.lane.b32.xlu1 %v1151_v40, %s2228_s26 }
 0x7a8   :  { %v1459_v2 = vpop.f32.mrf.mxu3 }
 0x7a9   :  { %1472 = vrot.lane.b32.xlu2 %v1459_v2, %s2227_s25  ;;  %s1854_s25 = sshll.u32 %s3020_s3, 4  ;;  %s1855_s25 = int_to_ptr.hbm [resolvable:$true] %s1854_s25 }
 0x7aa   :  { %v1004_v3 = vpop.f32.mrf.mxu0 }
 0x7ab   :  { %1016 = vst.msk [vmem:[#allocation2] sm:$0xff] %vm284_vm8, %v1004_v3 }
 0x7b2   :  { %v1007_v16 = vpop.f32.mrf.mxu0 }
 0x7b3   :  { %1017 = vst.msk [vmem:[#allocation2 + $0x8] sm:$0xff] %vm284_vm8, %v1007_v16 }
 0x7ba   :  { %v1010_v49 = vpop.f32.mrf.mxu0 }
 0x7bb   :  { %1018 = vst.msk [vmem:[#allocation2 + $0x10] sm:$0xff] %vm284_vm8, %v1010_v49 }
 0x7cc   :  { %v1159_v5 = vpop.permute.xlu2 %1158 }
 0x7cd   :  { %1170 = vst.msk [vmem:[#allocation2] sm:$0xff] %vm439_vm9, %v1159_v5 }
 0x7d5   :  { %v1161_v7 = vpop.permute.xlu2 %1160 }
 0x7d6   :  { %1171 = vst.msk [vmem:[#allocation2 + $0x8] sm:$0xff] %vm439_vm9, %v1161_v7 }
 0x7da   :  { %v1467_v19 = vpop.permute.xlu1 %1466 }
 0x7db   :  { %v1313_v53 = vpop.permute.xlu0 %1312 }
 0x7dc   :  { %1324 = vst.msk [vmem:[#allocation2] sm:$0xff] %vm594_vm10, %v1313_v53 }
 0x7dd   :  { %1478 = vst.msk [vmem:[#allocation2] sm:$0xff] %vm749_vm11, %v1467_v19  ;;  %v1469_v42 = vpop.permute.xlu2 %1468 }
 0x7e4   :  { %v1482_v29 = vld [vmem:[#allocation2] sm:$0xff] }
 0x7e5   :  { %v1487_v26 = vadd.f32 %v2035_v34, %v1482_v29 }
 0x7e7   :  { %v1491_v37 = vmax.f32 %v1487_v26, 0.0 }
 0x7e9   :  { %1911 = vmatmul.msk.f32.vlgmr.msrb.gmra.mxu0 %vm84_vm5, %v1491_v37 }
 0x7eb   :  { %v1315_v47 = vpop.permute.xlu0 %1314 }
 0x7ec   :  { %1325 = vst.msk [vmem:[#allocation2 + $0x8] sm:$0xff] %vm594_vm10, %v1315_v47 }
 0x7ed   :  { %1479 = vst.msk [vmem:[#allocation2 + $0x8] sm:$0xff] %vm749_vm11, %v1469_v42 }
 0x7f2   :  { %v1471_v44 = vpop.permute.xlu2 %1470 }
 0x7f4   :  { %v1483_v52 = vld [vmem:[#allocation2 + $0x8] sm:$0xff] }
 0x7f5   :  { %v1488_v22 = vadd.f32 %v2035_v34, %v1483_v52 }
 0x7f7   :  { %v1492_v11 = vmax.f32 %v1488_v22, 0.0 }
 0x7f9   :  { %1912 = vmatmul.msk.f32.gmra.mxu0 %vm84_vm5, %v1492_v11 }
 0x802   :  { %v1317_v36 = vpop.permute.xlu0 %1316 }
 0x803   :  { %v1473_v33 = vpop.permute.xlu2 %1472 }
 0x80d   :  { %v1163_v12 = vpop.permute.xlu1 %1162 }
 0x80e   :  { %1172 = vst.msk [vmem:[#allocation2 + $0x10] sm:$0xff] %vm439_vm9, %v1163_v12 }
 0x80f   :  { %1326 = vst.msk [vmem:[#allocation2 + $0x10] sm:$0xff] %vm594_vm10, %v1317_v36 }
 0x810   :  { %1480 = vst.msk [vmem:[#allocation2 + $0x10] sm:$0xff] %vm749_vm11, %v1471_v44 }
 0x812   :  { %v1319_v35 = vpop.permute.xlu0 %1318 }
 0x815   :  { %v1165_v63 = vpop.permute.xlu1 %1164 }
 0x817   :  { %v1484_v61 = vld [vmem:[#allocation2 + $0x10] sm:$0xff] }
 0x818   :  { %v1489_v20 = vadd.f32 %v2035_v34, %v1484_v61 }
 0x81a   :  { %v1493_v23 = vmax.f32 %v1489_v20, 0.0 }
 0x81c   :  { %1913 = vmatmul.msk.f32.gmra.mxu0 %vm84_vm5, %v1493_v23 }
 0x820   :  { %v1013_v45 = vpop.f32.mrf.mxu0 }
 0x821   :  { %1019 = vst.msk [vmem:[#allocation2 + $0x18] sm:$0xff] %vm284_vm8, %v1013_v45 }
 0x822   :  { %1173 = vst.msk [vmem:[#allocation2 + $0x18] sm:$0xff] %vm439_vm9, %v1165_v63 }
 0x823   :  { %1327 = vst.msk [vmem:[#allocation2 + $0x18] sm:$0xff] %vm594_vm10, %v1319_v35 }
 0x824   :  { %1481 = vst.msk [vmem:[#allocation2 + $0x18] sm:$0xff] %vm749_vm11, %v1473_v33 }
 0x82b   :  { %v1485_v21 = vld [vmem:[#allocation2 + $0x18] sm:$0xff] }
 0x82c   :  { %v1490_v27 = vadd.f32 %v2035_v34, %v1485_v21 }
 0x82e   :  { %v1494_v10 = vmax.f32 %v1490_v27, 0.0 }
 0x830   :  { %1914 = vmatmul.msk.f32.gmra.mxu0 %vm84_vm5, %v1494_v10 }
 0x866   :  { %v1531_v4 = vpop.f32.mrf.mxu0 }
 0x867   :  { %1915 = vmatmul.msk.f32.vlgmr.msra.gmra.mxu1 %vm42_vm1, %v1531_v4 }
 0x876   :  { %v1534_v28 = vpop.f32.mrf.mxu0 }
 0x877   :  { %1916 = vmatmul.msk.f32.gmra.mxu1 %vm42_vm1, %v1534_v28 }
 0x899   :  { %v1537_v13 = vpop.f32.mrf.mxu0 }
 0x89a   :  { %1917 = vmatmul.msk.f32.gmra.mxu1 %vm42_vm1, %v1537_v13 }
 0x8ad   :  { %v1540_v62 = vpop.f32.mrf.mxu0 }
 0x8ae   :  { %1918 = vmatmul.msk.f32.gmra.mxu1 %vm42_vm1, %v1540_v62  ;;  %1726 = vmatpush.msrb.mxu2 %v1540_v62 }
 0x8b0   :  { %1727 = vmatpush.msrb.mxu2 %v1537_v13  ;;  %v2036_v13 = vld [vmem:[%s3019_s2 + $0xb0] ss:$0 sm:$0xff] }
 0x8b2   :  { %1728 = vmatpush.msrb.mxu2 %v1534_v28 }
 0x8b4   :  { %1729 = vmatpush.msrb.mxu2 %v1531_v4 }
 0x8e4   :  { %v1572_v41 = vpop.f32.mrf.mxu1 }
 0x8e5   :  { %1618 = vperm.xlu1 %2031, %v1572_v41  }
 0x8f4   :  { %v1575_v31 = vpop.f32.mrf.mxu1 }
 0x8f5   :  { %1623 = vperm.xlu0 %2032, %v1575_v31  }
 0x917   :  { %v1578_v8 = vpop.f32.mrf.mxu1 }
 0x918   :  { %1628 = vperm.xlu2 %2033, %v1578_v8  }
 0x91a   :  { %1584 = vxpose.xlu1.b32.start [1/4] (short) (narrow) %v1572_v41, 8 }
 0x922   :  { %1585 = vxpose.xlu1.b32.cont [2/4] (short) (narrow) %v1575_v31, 8  ;;  %v2189_v31 = vld [vmem:[%s3017_s0] sm:$0xff] }
 0x92a   :  { %1586 = vxpose.xlu1.b32.cont [3/4] (short) (narrow) %v1578_v8, 8 }
 0x92b   :  { %v1581_v57 = vpop.f32.mrf.mxu1 }
 0x92c   :  { %1633 = vperm.xlu2 %2033, %v1581_v57  }
 0x932   :  { %1587 = vxpose.xlu1.b32.end [4/4] (short) (narrow) %v1581_v57, 8 }
 0x957   :  { %v1619_v46 = vpop.permute.xlu1 %1618 }
 0x967   :  { %v1624_v50 = vpop.permute.xlu0 %1623 }
 0x972   :  { %v1629_v48 = vpop.permute.xlu2 %1628 }
 0x986   :  { %v1634_v17 = vpop.permute.xlu2 %1633 }
 0x9be   :  { %v1600_v59 = vpop.trf.xlu1 }
 0x9bf   :  { %v1636_v51 = vperm.slane %v1600_v59, 0 }
 0x9c1   :  { %v1638_v55 = vadd.f32 %v1636_v51, %v1624_v50  ;;  %v1640_v15 = vadd.f32 %v1636_v51, %v1634_v17  ;;  %v1637_v30 = vadd.f32 %v1636_v51, %v1619_v46  ;;  %v1639_v56 = vadd.f32 %v1636_v51, %v1629_v48  ;;  %v2190_v51 = vld [vmem:[%s3017_s0 + $0x8] sm:$0xff] }
 0x9c3   :  { %vm1642_vm8 = vcmp.gt.f32.partialorder %v1638_v55, 0.0  ;;  %v1646_v32 = vmul.f32 0.2, %v1638_v55  ;;  %vm1641_vm9 = vcmp.gt.f32.partialorder %v1637_v30, 0.0  ;;  %v1645_v38 = vmul.f32 0.2, %v1637_v30 }
 0x9c4   :  { %v1648_v39 = vmul.f32 0.2, %v1640_v15  ;;  %v1647_v40 = vmul.f32 0.2, %v1639_v56  ;;  %vm1644_vm10 = vcmp.gt.f32.partialorder %v1640_v15, 0.0  ;;  %vm1643_vm11 = vcmp.gt.f32.partialorder %v1639_v56, 0.0 }
 0x9c5   :  { %v1650_v54 = vsel %vm1642_vm8, %v1638_v55, %v1646_v32  ;;  %v1649_v24 = vsel %vm1641_vm9, %v1637_v30, %v1645_v38 }
 0x9c6   :  { %v1654_v2 = vadd.f32 %v2707_v0, %v1650_v54  ;;  %v1653_v3 = vadd.f32 %v2669_v43, %v1649_v24  ;;  %v1652_v18 = vsel %vm1644_vm10, %v1640_v15, %v1648_v39  ;;  %v1651_v49 = vsel %vm1643_vm11, %v1639_v56, %v1647_v40  ;;  %v2191_v56 = vld [vmem:[%s3017_s0 + $0x10] sm:$0xff]  ;;  %v2192_v40 = vld [vmem:[%s3017_s0 + $0x18] sm:$0xff] }
 0x9c7   :  { %v1656_v6 = vadd.f32 %v2680_v1, %v1652_v18  ;;  %v1655_v5 = vadd.f32 %v2729_v25, %v1651_v49  ;;  %v1752_v18 = vld [vmem:[%s3019_s2 + $0xe0] sm:$0xff] }
 0x9c8   :  { %v1660_v14 = vsel %vm84_vm5, %v1654_v2, -inf  ;;  %v1657_v16 = vsel %vm84_vm5, %v1653_v3, -inf }
 0x9c9   :  { %1661 = vmax.xlane.f32.xlu2 %v1660_v14  ;;  %1658 = vmax.xlane.f32.xlu0 %v1657_v16  ;;  %v1666_v7 = vsel %vm84_vm5, %v1656_v6, -inf  ;;  %v1663_v0 = vsel %vm84_vm5, %v1655_v5, -inf  ;;  %v1751_v16 = vld [vmem:[%s3019_s2 + $0xd8] sm:$0xff] }
 0x9d1   :  { %1667 = vmax.xlane.f32.xlu2 %v1666_v7  ;;  %1664 = vmax.xlane.f32.xlu0 %v1663_v0 }
 0xa3c   :  { %v1662_v43 = vpop.xlane.xlu2 %1661  ;;  %v1659_v19 = vpop.xlane.xlu0 %1658 }
 0xa3d   :  { %v1670_v53 = vsub.f32 %v1654_v2, %v1662_v43  ;;  %v1669_v34 = vsub.f32 %v1653_v3, %v1659_v19  ;;  %v1754_v19 = vld [vmem:[%s3019_s2 + $0xf0] sm:$0xff] }
 0xa3f   :  { %v1675_v29 = vmul.f32 1.442695, %v1670_v53  ;;  %v1673_v26 = vmul.f32 1.442695, %v1669_v34 }
 0xa41   :  { %2165 = vpow2.f32 %v1675_v29 }
 0xa42   :  { %2167 = vpow2.f32 %v1673_v26 }
 0xa44   :  { %v1668_v37 = vpop.xlane.xlu2 %1667  ;;  %v1665_v47 = vpop.xlane.xlu0 %1664 }
 0xa45   :  { %v1672_v42 = vsub.f32 %v1656_v6, %v1668_v37  ;;  %v1671_v1 = vsub.f32 %v1655_v5, %v1665_v47  ;;  %v1753_v5 = vld [vmem:[%s3019_s2 + $0xe8] sm:$0xff]  ;;  %s2230_s2 = smov [#allocation3]  }
 0xa46   :  { %s1852_s4 = sshll.u32 %s2230_s2, 4  ;;  %s1853_s4 = int_to_ptr.vmem [resolvable:$true] %s1852_s4 }
 0xa47   :  { %v2166_v52 = vpop.eup %2165  ;;  %v1679_v25 = vmul.f32 1.442695, %v1672_v42  ;;  %v1677_v22 = vmul.f32 1.442695, %v1671_v1 }
 0xa48   :  { %v2168_v11 = vpop.eup %2167  ;;  %v1684_v12 = vsel %vm84_vm5, %v2166_v52, 0.0 }
 0xa49   :  { %2169 = vpow2.f32 %v1679_v25  ;;  %1685 = vadd.xlane.f32.xlu2 %v1684_v12  ;;  %v1681_v36 = vsel %vm84_vm5, %v2168_v11, 0.0 }
 0xa4a   :  { %2171 = vpow2.f32 %v1677_v22  ;;  %1682 = vadd.xlane.f32.xlu0 %v1681_v36 }
 0xa4f   :  { %v2170_v44 = vpop.eup %2169 }
 0xa50   :  { %v2172_v60 = vpop.eup %2171  ;;  %v1690_v58 = vsel %vm84_vm5, %v2170_v44, 0.0 }
 0xa51   :  { %1691 = vadd.xlane.f32.xlu2 %v1690_v58  ;;  %v1687_v61 = vsel %vm84_vm5, %v2172_v60, 0.0 }
 0xa52   :  { %1688 = vadd.xlane.f32.xlu0 %v1687_v61 }
 0xabc   :  { %v1686_v23 = vpop.xlane.xlu2 %1685 }
 0xabd   :  { %v1683_v20 = vpop.xlane.xlu0 %1682 }
 0xabe   :  { %2173 = vrcp.f32 %v1683_v20 }
 0xabf   :  { %2175 = vrcp.f32 %v1686_v23 }
 0xac4   :  { %v2174_v45 = vpop.eup %2173  ;;  %v1692_v27 = vpop.xlane.xlu2 %1691 }
 0xac5   :  { %v1697_v63 = vmul.f32 %v2174_v45, %v2168_v11  ;;  %v1689_v35 = vpop.xlane.xlu0 %1688  ;;  %v2176_v33 = vpop.eup %2175 }
 0xac6   :  { %2177 = vrcp.f32 %v1689_v35  ;;  %v1698_v21 = vmul.f32 %v2176_v33, %v2166_v52 }
 0xac7   :  { %1919 = vmatmul.msk.f32.vlgmr.msrb.gmra.mxu2 %vm84_vm5, %v1697_v63  ;;  %2179 = vrcp.f32 %v1692_v27 }
 0xacc   :  { %v2178_v10 = vpop.eup %2177 }
 0xacd   :  { %v1699_v4 = vmul.f32 %v2178_v10, %v2172_v60  ;;  %v2180_v28 = vpop.eup %2179 }
 0xace   :  { %v1700_v9 = vmul.f32 %v2180_v28, %v2170_v44 }
 0xacf   :  { %1920 = vmatmul.msk.f32.gmra.mxu2 %vm84_vm5, %v1698_v21 }
 0xad7   :  { %1921 = vmatmul.msk.f32.gmra.mxu2 %vm84_vm5, %v1699_v4 }
 0xadf   :  { %1922 = vmatmul.msk.f32.gmra.mxu2 %vm84_vm5, %v1700_v9  ;;  %vm1780_vm5 = vcmask 7168  }
 0xae0   :  { %v1795_v49 = vsel %vm1780_vm5, %v1751_v16, 0.0  ;;  %v1796_v6 = vsel %vm1780_vm5, %v1752_v18, 0.0  ;;  %v1798_v0 = vsel %vm1780_vm5, %v1753_v5, 0.0  ;;  %v1800_v53 = vsel %vm1780_vm5, %v1754_v19, 0.0 }
 0xae1   :  { %v1797_v7 = vadd.f32 %v1796_v6, %v1795_v49 }
 0xae3   :  { %v1799_v43 = vadd.f32 %v1798_v0, %v1797_v7 }
 0xae5   :  { %v1801_v34 = vadd.f32 %v1800_v53, %v1799_v43 }
 0xae7   :  { %v1802_v29 = vrot.slane %v1801_v34, 4 }
 0xae9   :  { %v1803_v26 = vadd.f32 %v1802_v29, %v1801_v34 }
 0xaeb   :  { %v1804_v37 = vrot.slane %v1803_v26, 2 }
 0xaed   :  { %v1805_v47 = vadd.f32 %v1804_v37, %v1803_v26 }
 0xaef   :  { %v1806_v42 = vrot.slane %v1805_v47, 1 }
 0xaf1   :  { %v1807_v1 = vadd.f32 %v1806_v42, %v1805_v47 }
 0xaf3   :  { %v1810_v52 = vsub.f32 32.0, %v1807_v1  ;;  %v1808_v25 = vmul.f32 16.0, %v1807_v1 }
 0xaf5   :  { %v1811_v22 = vmul.f32 16.0, %v1810_v52  ;;  %v1809_v11 = vmax.f32 %v1808_v25, 1.0 }
 0xaf7   :  { %v1812_v12 = vmax.f32 %v1811_v22, 1.0  ;;  %2181 = vrcp.f32 %v1809_v11 }
 0xaf9   :  { %2183 = vrcp.f32 %v1812_v12  ;;  %vm1834_vm4 = vweird.f32 %v1812_v12 }
 0xafd   :  { %v2182_v23 = vpop.eup %2181 }
 0xafe   :  { %v1814_v28 = vmul.f32 %v2182_v23, %v1809_v11  ;;  %vm1819_vm3 = vweird.f32 %v2182_v23 }
 0xaff   :  { %v2184_v45 = vpop.eup %2183 }
 0xb00   :  { %v1830_v9 = vmul.f32 %v2184_v45, %v1812_v12  ;;  %vm1835_vm6 = vweird.f32 %v2184_v45 }
 0xb01   :  { %vm1836_vm12 = vmor %vm1834_vm4, %vm1835_vm6 }
 0xb4a   :  { %v1731_v62 = vpop.f32.mrf.mxu2 }
 0xb4b   :  { %v1732_v41 = vadd.f32 %v2036_v13, %v1731_v62 }
 0xb4d   :  { %v1743_v8 = vsub.f32 %v2189_v31, %v1732_v41 }
 0xb4f   :  { %v1747_v57 = vmul.f32 %v1743_v8, %v1743_v8 }
 0xb51   :  { %v1755_v46 = vsel %vm42_vm1, %v1747_v57, 0.0 }
 0xb52   :  { %v1734_v48 = vpop.f32.mrf.mxu2  ;;  %1756 = vadd.xlane.f32.xlu0 %v1755_v46  ;;  %v1815_v46 = vsub.f32 1.0, %v1814_v28 }
 0xb53   :  { %v1735_v59 = vadd.f32 %v2036_v13, %v1734_v48  ;;  %v1831_v48 = vsub.f32 1.0, %v1830_v9 }
 0xb55   :  { %v1744_v50 = vsub.f32 %v2190_v51, %v1735_v59 }
 0xb57   :  { %v1748_v17 = vmul.f32 %v1744_v50, %v1744_v50 }
 0xb59   :  { %v1758_v55 = vsel %vm42_vm1, %v1748_v17, 0.0 }
 0xb5a   :  { %1759 = vadd.xlane.f32.xlu1 %v1758_v55  ;;  %v1737_v15 = vpop.f32.mrf.mxu2  ;;  %v1816_v55 = vmul.f32 %v2182_v23, %v1815_v46 }
 0xb5b   :  { %v1738_v30 = vadd.f32 %v2036_v13, %v1737_v15  ;;  %v1832_v15 = vmul.f32 %v2184_v45, %v1831_v48 }
 0xb5d   :  { %v1745_v32 = vsub.f32 %v2191_v56, %v1738_v30 }
 0xb5f   :  { %v1749_v38 = vmul.f32 %v1745_v32, %v1745_v32  ;;  %v1822_v32 = vand.u32 2147483647, %v1809_v11 }
 0xb61   :  { %v1761_v54 = vsel %vm42_vm1, %v1749_v38, 0.0  ;;  %v1824_v38 = vand.u32 2147483648, %v1809_v11  ;;  %vm1823_vm13 = vcmp.eq.f32.partialorder %v1822_v32, 8.507059e+37 }
 0xb62   :  { %v1740_v24 = vpop.f32.mrf.mxu2  ;;  %1762 = vadd.xlane.f32.xlu2 %v1761_v54  ;;  %v1838_v54 = vand.u32 2147483647, %v1812_v12 }
 0xb63   :  { %v1741_v39 = vadd.f32 %v2036_v13, %v1740_v24  ;;  %v1840_v24 = vand.u32 2147483648, %v1812_v12 }
 0xb64   :  { %vm1839_vm14 = vcmp.eq.f32.partialorder %v1838_v54, 8.507059e+37 }
 0xb65   :  { %v1746_v2 = vsub.f32 %v2192_v40, %v1741_v39 }
 0xb67   :  { %v1750_v3 = vmul.f32 %v1746_v2, %v1746_v2  ;;  %v1817_v2 = vadd.f32 %v2182_v23, %v1816_v55 }
 0xb69   :  { %v1764_v14 = vsel %vm42_vm1, %v1750_v3, 0.0  ;;  %vm1818_vm1 = vweird.f32 %v1809_v11  ;;  %v1833_v3 = vadd.f32 %v2184_v45, %v1832_v15 }
 0xb6a   :  { %1765 = vadd.xlane.f32.xlu0 %v1764_v14  ;;  %vm1820_vm7 = vmor %vm1818_vm1, %vm1819_vm3 }
 0xb6b   :  { %v1837_v7 = vsel %vm1836_vm12, %v2184_v45, %v1833_v3 }
 0xbc5   :  { %v1757_v44 = vpop.xlane.xlu0 %1756 }
 0xbc6   :  { %v1776_v61 = vmul.f32 %v1757_v44, %v1751_v16  ;;  %v1825_v16 = vor.u32 1.1754944e-38, %v1824_v38 }
 0xbc8   :  { %v1781_v33 = vsel %vm1780_vm5, %v1776_v61, 0.0 }
 0xbcd   :  { %v1760_v36 = vpop.xlane.xlu1 %1759 }
 0xbce   :  { %v1777_v58 = vmul.f32 %v1760_v36, %v1752_v18  ;;  %v1767_v63 = vadd.f32 %v1760_v36, %v1757_v44  ;;  %v1841_v18 = vor.u32 1.1754944e-38, %v1840_v24 }
 0xbd0   :  { %v1782_v35 = vsel %vm1780_vm5, %v1777_v58, 0.0 }
 0xbd1   :  { %v1783_v10 = vadd.f32 %v1782_v35, %v1781_v33 }
 0xbd5   :  { %v1763_v60 = vpop.xlane.xlu2 %1762 }
 0xbd6   :  { %v1778_v20 = vmul.f32 %v1763_v60, %v1753_v5  ;;  %v1768_v21 = vadd.f32 %v1767_v63, %v1763_v60  ;;  %v1821_v5 = vsel %vm1820_vm7, %v2182_v23, %v1817_v2 }
 0xbd7   :  { %v1826_v43 = vsel %vm1823_vm13, %v1825_v16, %v1821_v5 }
 0xbd8   :  { %v1784_v27 = vsel %vm1780_vm5, %v1778_v20, 0.0 }
 0xbd9   :  { %v1785_v41 = vadd.f32 %v1784_v27, %v1783_v10 }
 0xbdd   :  { %v1766_v4 = vpop.xlane.xlu0 %1765 }
 0xbde   :  { %v1769_v13 = vadd.f32 %v1768_v21, %v1766_v4  ;;  %v1779_v62 = vmul.f32 %v1766_v4, %v1754_v19  ;;  %v1842_v19 = vsel %vm1839_vm14, %v1841_v18, %v1837_v7 }
 0xbe0   :  { %v1770_v31 = vrot.slane %v1769_v13, 4  ;;  %v1786_v8 = vsel %vm1780_vm5, %v1779_v62, 0.0 }
 0xbe1   :  { %v1787_v57 = vadd.f32 %v1786_v8, %v1785_v41 }
 0xbe2   :  { %v1771_v59 = vadd.f32 %v1770_v31, %v1769_v13 }
 0xbe3   :  { %v1788_v51 = vrot.slane %v1787_v57, 4 }
 0xbe4   :  { %v1772_v50 = vrot.slane %v1771_v59, 2 }
 0xbe5   :  { %v1789_v17 = vadd.f32 %v1788_v51, %v1787_v57 }
 0xbe6   :  { %v1773_v30 = vadd.f32 %v1772_v50, %v1771_v59 }
 0xbe7   :  { %v1790_v56 = vrot.slane %v1789_v17, 2 }
 0xbe8   :  { %v1774_v39 = vrot.slane %v1773_v30, 1 }
 0xbe9   :  { %v1791_v40 = vadd.f32 %v1790_v56, %v1789_v17 }
 0xbea   :  { %v1775_v49 = vadd.f32 %v1774_v39, %v1773_v30 }
 0xbeb   :  { %v1792_v14 = vrot.slane %v1791_v40, 1 }
 0xbed   :  { %v1793_v6 = vadd.f32 %v1792_v14, %v1791_v40 }
 0xbef   :  { %v1794_v0 = vsub.f32 %v1775_v49, %v1793_v6  ;;  %v1827_v34 = vmul.f32 %v1826_v43, %v1793_v6 }
 0xbf1   :  { %v1828_v53 = vmul.f32 0.5, %v1794_v0 }
 0xbf3   :  { %v1843_v29 = vmul.f32 %v1842_v19, %v1828_v53 }
 0xbf5   :  { %v1844_v26 = vadd.f32 %v1843_v29, %v1827_v34 }
 0xbf7   :  { %1846 = vst.msk [vmem:[#allocation3] sm:$0x1] %vm1845_vm15, %v1844_v26 }
 0xbf8   :  { %1857 = dma.vmem_to_hbm [thread:$0]  %s1853_s4, 16, %s1855_s25, [#allocation4]  }
 0xbf9   :  { %2217 = dma.done.wait [#allocation4], 16  }
 0xbfa   :  { %2218 = vsyncadd [#allocation4], 4294967280 }
 0xbfb   :  { %1862 = vsyncpa [#allocation4], 1 }

</bundles_post_ra>
